<compile_context>
chip_gen: v6e
topology: v6e:2x2x1
jax: 0.10.0
libtpu: 0.0.40
codegen_flags: <defaults>
</compile_context>

<pallas_src>
import functools

import jax
import jax.numpy as jnp
from jax import lax
from jax.experimental import pallas as pl
from jax.experimental.pallas import tpu as pltpu

LANE = 128
SUBLANE = 8


def _tgn_kernel(edata_ref, freqs_ref, wx_ref, ws_ref, wc_ref, b_ref,
                out_ref, iota_ref, *, apply_relu):
    """Grid = (edge_shards [parallel], edge_tiles [arbitrary]).

    edata_ref : [Cin + 2, TE] int32  packed edge data (one DMA per step):
                  rows [0, Cin)  : x_j^T      (f32 bits)
                  row  Cin       : timestamps (f32 bits)
                  row  Cin + 1   : scatter targets (int32; padded edges = N_pad, OOR)
    freqs_ref : [T, 1]   f32    TimeEmbedding.freqs
    wx_ref    : [Cin, Cout_pad] linear weight slice for x_j
    ws_ref    : [T,   Cout_pad] linear weight slice for sin(t * freqs)
    wc_ref    : [T,   Cout_pad] linear weight slice for cos(t * freqs)
    b_ref     : [1,   Cout_pad]
    out_ref   : [N_pad, Cout_pad] resident accumulator for this edge shard
    iota_ref  : [N_pad, 1] int32 scratch (node-id column, hoisted across edge tiles)
    """
    e = pl.program_id(1)

    @pl.when(e == 0)
    def _():
        out_ref[...] = jnp.zeros_like(out_ref)
        iota_ref[...] = lax.broadcasted_iota(jnp.int32, iota_ref.shape, 0)

    cin = wx_ref.shape[0]

    # ---- unpack the single edge DMA (bit-exact reinterpretation, no arithmetic) ----
    x_jt = pltpu.bitcast(edata_ref[0:cin, :], jnp.float32)            # [Cin, TE]
    ts = pltpu.bitcast(edata_ref[cin:cin + 1, :], jnp.float32)        # [1,   TE]
    tgt = edata_ref[cin + 1:cin + 2, :]                               # [1,   TE] int32

    # ---- time encoding, edges lane-major: tf = t * freqs -> [T, TE] ----
    tf = freqs_ref[...] * ts
    sin_tf = jnp.sin(tf)
    cos_tf = jnp.cos(tf)

    # ---- message linear on concat([x_j, sin, cos]) as split matmuls (padded Cout) ----
    msg = (lax.dot_general(x_jt, wx_ref[...], (((0,), (0,)), ((), ())),
                           preferred_element_type=jnp.float32)
           + lax.dot_general(sin_tf, ws_ref[...], (((0,), (0,)), ((), ())),
                             preferred_element_type=jnp.float32)
           + lax.dot_general(cos_tf, wc_ref[...], (((0,), (0,)), ((), ())),
                             preferred_element_type=jnp.float32)
           + b_ref[...])                                              # [TE, Cout_pad]

    # ---- scatter-add (aggr='add') via one-hot matmul against the hoisted iota column.
    # Padded edges carry an out-of-range target id, so they (and their bias term)
    # contribute exactly nothing.
    tgt_oh = (iota_ref[...] == tgt).astype(jnp.float32)               # [N_pad, TE]
    out_ref[...] += jnp.dot(tgt_oh, msg, preferred_element_type=jnp.float32)

    if apply_relu:
        @pl.when(e == pl.num_programs(1) - 1)
        def _():
            out_ref[...] = jnp.maximum(out_ref[...], 0.0)


def _pick_vmem_limit():
    """~96 MiB on v5e/v6e (128 MiB physical), ~48 MiB on v7x (64 MiB per TC)."""
    cap = 128 * 1024 * 1024
    try:
        info = pltpu.get_tpu_info()
        cap = int(getattr(info, "vmem_capacity_bytes", cap))
    except Exception:
        pass
    return int(min(cap * 3 // 4, 96 * 1024 * 1024))


def tgn_layer_forward(x, edge_index, edge_timestamps, params, *,
                      edge_tile=256, num_shards=1, vmem_limit_bytes=None):
    """Pre-gathers x_j, packs lane-major edge tiles, and invokes the Pallas kernel."""
    n_nodes, in_ch = x.shape
    weight = params["weight"].astype(jnp.float32)      # [Cout, Cin + 2T]
    bias = params["bias"].astype(jnp.float32)          # [Cout]
    freqs = params["freqs"].astype(jnp.float32)        # [T]
    out_ch = weight.shape[0]
    t_dim = freqs.shape[0]
    n_edges = edge_index.shape[1]

    if n_edges == 0:                                    # empty grid guard
        return jnp.zeros((n_nodes, out_ch), jnp.float32)

    assert edge_tile % LANE == 0, "edge_tile must be a multiple of 128"
    assert num_shards >= 1

    # --- lane-dense output channels: pad Cout to a multiple of 128 ---
    cout_pad = pl.cdiv(out_ch, LANE) * LANE
    wt = jnp.pad(weight.T, ((0, 0), (0, cout_pad - out_ch)))   # [Cin+2T, Cout_pad]
    wx = wt[:in_ch]
    ws = wt[in_ch:in_ch + t_dim]
    wc = wt[in_ch + t_dim:]
    b = jnp.pad(bias, (0, cout_pad - out_ch)).reshape(1, cout_pad)
    freqs2 = freqs.reshape(t_dim, 1)

    n_pad = pl.cdiv(n_nodes, SUBLANE) * SUBLANE

    # --- edge blocking: pad to num_shards * edge_tile; shard axis is "parallel" ---
    chunk = num_shards * edge_tile
    e_pad = pl.cdiv(n_edges, chunk) * chunk
    tiles_total = e_pad // edge_tile
    tiles_per_shard = tiles_total // num_shards
    ep = e_pad - n_edges

    src = edge_index[0].astype(jnp.int32)
    # Padded edges get an out-of-range target id so they drop out of the scatter.
    tgt = jnp.pad(edge_index[1].astype(jnp.int32), (0, ep), constant_values=n_pad)
    ts = jnp.pad(edge_timestamps.astype(jnp.float32), (0, ep))

    # --- pre-gather source features with XLA (replaces the in-kernel one-hot gather) ---
    x_j = x.astype(jnp.float32)[src]                                   # [E, Cin]
    x_jt = jnp.pad(x_j.T, ((0, 0), (0, ep)))                           # [Cin, E_pad]

    # --- pack all per-edge data into ONE lane-major int32 array (single DMA / step) ---
    x_bits = lax.bitcast_convert_type(x_jt, jnp.int32)                 # [Cin, E_pad]
    ts_bits = lax.bitcast_convert_type(ts, jnp.int32)                  # [E_pad]
    edata = jnp.concatenate([x_bits, ts_bits[None, :], tgt[None, :]], axis=0)
    rows = in_ch + 2
    edata = edata.reshape(rows, tiles_total, edge_tile).transpose(1, 0, 2)

    edata_spec = pl.BlockSpec((None, rows, edge_tile),
                              lambda s, e: (s * tiles_per_shard + e, 0, 0))

    def const(shape):
        return pl.BlockSpec(shape, lambda s, e: (0,) * len(shape))

    if vmem_limit_bytes is None:
        vmem_limit_bytes = _pick_vmem_limit()

    flops = (2 * e_pad * (in_ch + 2 * t_dim) * cout_pad          # message linear
             + 2 * e_pad * n_pad * cout_pad)                     # scatter one-hot matmul
    transcendentals = 2 * e_pad * t_dim
    bytes_accessed = 4 * (edata.size + freqs2.size + wx.size + ws.size + wc.size
                          + b.size + num_shards * n_pad * cout_pad)
    cost = pl.CostEstimate(flops=flops, transcendentals=transcendentals,
                           bytes_accessed=bytes_accessed)

    kernel = functools.partial(_tgn_kernel, apply_relu=(num_shards == 1))

    out = pl.pallas_call(
        kernel,
        out_shape=jax.ShapeDtypeStruct((num_shards, n_pad, cout_pad), jnp.float32),
        grid=(num_shards, tiles_per_shard),
        in_specs=[edata_spec,
                  const((t_dim, 1)),
                  const((in_ch, cout_pad)),
                  const((t_dim, cout_pad)),
                  const((t_dim, cout_pad)),
                  const((1, cout_pad))],
        out_specs=pl.BlockSpec((None, n_pad, cout_pad), lambda s, e: (s, 0, 0)),
        scratch_shapes=[pltpu.VMEM((n_pad, 1), jnp.int32)],
        compiler_params=pltpu.CompilerParams(
            dimension_semantics=("parallel", "arbitrary"),
            vmem_limit_bytes=vmem_limit_bytes,
        ),
        cost_estimate=cost,
    )(edata, freqs2, wx, ws, wc, b)

    if num_shards == 1:
        agg = out[0]                                   # ReLU already applied in kernel
    else:
        agg = jnp.maximum(jnp.sum(out, axis=0), 0.0)   # combine edge-shard partials
    return agg[:n_nodes, :out_ch]


def init_params(key, in_channels, out_channels, time_dim):
    """Deterministic synthetic parameters matching the torch module's shapes."""
    k1, k2, k3 = jax.random.split(key, 3)
    freqs = jax.random.normal(k1, (time_dim,), dtype=jnp.float32)          # TimeEmbedding.freqs
    fan_in = in_channels + 2 * time_dim
    bound = 1.0 / (fan_in ** 0.5)
    weight = jax.random.uniform(k2, (out_channels, fan_in),
                                minval=-bound, maxval=bound, dtype=jnp.float32)  # nn.Linear.weight
    bias = jax.random.uniform(k3, (out_channels,),
                              minval=-bound, maxval=bound, dtype=jnp.float32)    # nn.Linear.bias
    return {"freqs": freqs, "weight": weight, "bias": bias}


def tgn_layer_ref(x, edge_index, edge_timestamps, params):
    """Pure-JAX reference mirroring the PyTorch semantics (for verification)."""
    freqs = params["freqs"]
    t = edge_timestamps[:, None] * freqs
    t_enc = jnp.concatenate([jnp.sin(t), jnp.cos(t)], axis=-1)
    x_j = x[edge_index[0]]
    msg = jnp.concatenate([x_j, t_enc], axis=-1) @ params["weight"].T + params["bias"]
    n_nodes = x.shape[0]
    agg = jnp.zeros((n_nodes, msg.shape[1]), jnp.float32).at[edge_index[1]].add(msg)
    return jnp.maximum(agg, 0.0)


if __name__ == "__main__":
    num_nodes = 64
    num_edges = 300           # pads to 2 edge tiles of 256 -> exercises the pipeline
    in_channels = 8
    out_channels = 16
    time_dim = 4

    key = jax.random.PRNGKey(0)
    k_x, k_ei, k_t, k_p = jax.random.split(key, 4)

    x = jax.random.normal(k_x, (num_nodes, in_channels), dtype=jnp.float32)
    edge_index = jax.random.randint(k_ei, (2, num_edges), 0, num_nodes, dtype=jnp.int32)
    edge_timestamps = jax.random.uniform(k_t, (num_edges,), dtype=jnp.float32) * 10.0

    params = init_params(k_p, in_channels, out_channels, time_dim)
    ref = tgn_layer_ref(x, edge_index, edge_timestamps, params)

    # default path: single edge shard, ReLU fused in-kernel
    out = tgn_layer_forward(x, edge_index, edge_timestamps, params)
    out = jax.block_until_ready(out)
    assert out.shape == (num_nodes, out_channels)
    err = float(jnp.max(jnp.abs(out - ref)))
    assert err < 1e-4, f"mismatch vs reference (max abs err = {err})"

    # edge-sharded path (v7x 2-TC megacore layout): partial accumulators summed in XLA
    out2 = tgn_layer_forward(x, edge_index, edge_timestamps, params,
                             edge_tile=128, num_shards=2)
    out2 = jax.block_until_ready(out2)
    err2 = float(jnp.max(jnp.abs(out2 - ref)))
    assert err2 < 1e-4, f"sharded mismatch vs reference (max abs err = {err2})"

    print("KERNEL_OK")
</pallas_src>

<mosaic_0001>
module attributes {stable_mosaic.version = 11 : i64} {
  func.func @_tgn_kernel(%arg0: i32, %arg1: i32, %arg2: memref<1x10x256xi32, #tpu.memory_space<vmem>>, %arg3: memref<4x1xf32, #tpu.memory_space<vmem>>, %arg4: memref<8x128xf32, #tpu.memory_space<vmem>>, %arg5: memref<4x128xf32, #tpu.memory_space<vmem>>, %arg6: memref<4x128xf32, #tpu.memory_space<vmem>>, %arg7: memref<1x128xf32, #tpu.memory_space<vmem>>, %arg8: memref<1x64x128xf32, #tpu.memory_space<vmem>>, %arg9: memref<64x1xi32, #tpu.memory_space<vmem>>) attributes {dimension_semantics = [#tpu.dimension_semantics<parallel>, #tpu.dimension_semantics<arbitrary>], iteration_bounds = array<i64: 1, 2>, scalar_prefetch = 0 : i64, scratch_operands = 1 : i64, tpu.core_type = #tpu.core_type<tc>, window_params = [{transform_indices = @transform_0, window_bounds = array<i64: 1, 10, 256>}, {pipeline_mode = #tpu.pipeline_mode<synchronous>, transform_indices = @transform_1, window_bounds = array<i64: 4, 1>}, {pipeline_mode = #tpu.pipeline_mode<synchronous>, transform_indices = @transform_2, window_bounds = array<i64: 8, 128>}, {pipeline_mode = #tpu.pipeline_mode<synchronous>, transform_indices = @transform_3, window_bounds = array<i64: 4, 128>}, {pipeline_mode = #tpu.pipeline_mode<synchronous>, transform_indices = @transform_4, window_bounds = array<i64: 4, 128>}, {pipeline_mode = #tpu.pipeline_mode<synchronous>, transform_indices = @transform_5, window_bounds = array<i64: 1, 128>}, {transform_indices = @transform_6, window_bounds = array<i64: 1, 64, 128>}]} {
    %c0_i32 = arith.constant 0 : i32
    %0 = arith.cmpi eq, %arg1, %c0_i32 : i32
    %1 = arith.extui %0 : i1 to i32
    %c0_i32_0 = arith.constant 0 : i32
    %2 = arith.cmpi ne, %1, %c0_i32_0 : i32
    scf.if %2 {
      %cst_29 = arith.constant 0.000000e+00 : f32
      %44 = vector.broadcast %cst_29 : f32 to vector<64x128xf32>
      %c0_30 = arith.constant 0 : index
      %c0_31 = arith.constant 0 : index
      %c0_32 = arith.constant 0 : index
      %45 = vector.load %arg8[%c0_30, %c0_31, %c0_32] : memref<1x64x128xf32, #tpu.memory_space<vmem>>, vector<1x64x128xf32>
      %46 = vector.shape_cast %45 : vector<1x64x128xf32> to vector<64x128xf32>
      %47 = vector.shape_cast %44 : vector<64x128xf32> to vector<1x64x128xf32>
      tpu.vector_store %arg8[%c0_30, %c0_31, %c0_32], %47 {strides = array<i32>} : memref<1x64x128xf32, #tpu.memory_space<vmem>>, vector<1x64x128xf32>,
      %48 = tpu.iota {dimensions = array<i32: 0>} : vector<64x1xi32>
      %c0_33 = arith.constant 0 : index
      %c0_34 = arith.constant 0 : index
      %49 = vector.load %arg9[%c0_33, %c0_34] : memref<64x1xi32, #tpu.memory_space<vmem>>, vector<64x1xi32>
      tpu.vector_store %arg9[%c0_33, %c0_34], %48 {strides = array<i32>} : memref<64x1xi32, #tpu.memory_space<vmem>>, vector<64x1xi32>,
    } else {
    }
    %c0 = arith.constant 0 : index
    %c0_1 = arith.constant 0 : index
    %c0_2 = arith.constant 0 : index
    %3 = vector.load %arg2[%c0, %c0_1, %c0_2] : memref<1x10x256xi32, #tpu.memory_space<vmem>>, vector<1x8x256xi32>
    %4 = vector.shape_cast %3 : vector<1x8x256xi32> to vector<8x256xi32>
    %5 = tpu.bitcast %4 : vector<8x256xi32> -> vector<8x256xf32>
    %c0_3 = arith.constant 0 : index
    %c8 = arith.constant 8 : index
    %c0_4 = arith.constant 0 : index
    %6 = vector.load %arg2[%c0_3, %c8, %c0_4] : memref<1x10x256xi32, #tpu.memory_space<vmem>>, vector<1x1x256xi32>
    %7 = vector.shape_cast %6 : vector<1x1x256xi32> to vector<1x256xi32>
    %8 = tpu.bitcast %7 : vector<1x256xi32> -> vector<1x256xf32>
    %c0_5 = arith.constant 0 : index
    %c9 = arith.constant 9 : index
    %c0_6 = arith.constant 0 : index
    %9 = vector.load %arg2[%c0_5, %c9, %c0_6] : memref<1x10x256xi32, #tpu.memory_space<vmem>>, vector<1x1x256xi32>
    %10 = vector.shape_cast %9 : vector<1x1x256xi32> to vector<1x256xi32>
    %c0_7 = arith.constant 0 : index
    %c0_8 = arith.constant 0 : index
    %11 = vector.load %arg3[%c0_7, %c0_8] : memref<4x1xf32, #tpu.memory_space<vmem>>, vector<4x1xf32>
    %12 = vector.broadcast %11 : vector<4x1xf32> to vector<4x256xf32>
    %13 = vector.broadcast %8 : vector<1x256xf32> to vector<4x256xf32>
    %14 = arith.mulf %12, %13 : vector<4x256xf32>
    %15 = math.sin %14 : vector<4x256xf32>
    %16 = math.cos %14 : vector<4x256xf32>
    %c0_9 = arith.constant 0 : index
    %c0_10 = arith.constant 0 : index
    %17 = vector.load %arg4[%c0_9, %c0_10] : memref<8x128xf32, #tpu.memory_space<vmem>>, vector<8x128xf32>
    %cst = arith.constant dense<0.000000e+00> : vector<256x128xf32>
    %18 = tpu.matmul %5, %17, %cst {dimension_numbers = #tpu.dot_dimension_numbers<[0], [0], [1], [1], [0, 1, 1, 1], [], []>} : vector<8x256xf32>, vector<8x128xf32>, vector<256x128xf32> -> vector<256x128xf32>
    %c0_11 = arith.constant 0 : index
    %c0_12 = arith.constant 0 : index
    %19 = vector.load %arg5[%c0_11, %c0_12] : memref<4x128xf32, #tpu.memory_space<vmem>>, vector<4x128xf32>
    %cst_13 = arith.constant dense<0.000000e+00> : vector<256x128xf32>
    %20 = tpu.matmul %15, %19, %cst_13 {dimension_numbers = #tpu.dot_dimension_numbers<[0], [0], [1], [1], [0, 1, 1, 1], [], []>} : vector<4x256xf32>, vector<4x128xf32>, vector<256x128xf32> -> vector<256x128xf32>
    %21 = arith.addf %18, %20 : vector<256x128xf32>
    %c0_14 = arith.constant 0 : index
    %c0_15 = arith.constant 0 : index
    %22 = vector.load %arg6[%c0_14, %c0_15] : memref<4x128xf32, #tpu.memory_space<vmem>>, vector<4x128xf32>
    %cst_16 = arith.constant dense<0.000000e+00> : vector<256x128xf32>
    %23 = tpu.matmul %16, %22, %cst_16 {dimension_numbers = #tpu.dot_dimension_numbers<[0], [0], [1], [1], [0, 1, 1, 1], [], []>} : vector<4x256xf32>, vector<4x128xf32>, vector<256x128xf32> -> vector<256x128xf32>
    %24 = arith.addf %21, %23 : vector<256x128xf32>
    %c0_17 = arith.constant 0 : index
    %c0_18 = arith.constant 0 : index
    %25 = vector.load %arg7[%c0_17, %c0_18] : memref<1x128xf32, #tpu.memory_space<vmem>>, vector<1x128xf32>
    %26 = vector.broadcast %25 : vector<1x128xf32> to vector<256x128xf32>
    %27 = arith.addf %24, %26 : vector<256x128xf32>
    %c0_19 = arith.constant 0 : index
    %c0_20 = arith.constant 0 : index
    %28 = vector.load %arg9[%c0_19, %c0_20] : memref<64x1xi32, #tpu.memory_space<vmem>>, vector<64x1xi32>
    %29 = vector.broadcast %28 : vector<64x1xi32> to vector<64x256xi32>
    %30 = vector.broadcast %10 : vector<1x256xi32> to vector<64x256xi32>
    %31 = arith.cmpi eq, %29, %30 : vector<64x256xi32>
    %32 = arith.extui %31 : vector<64x256xi1> to vector<64x256xi32>
    %33 = arith.sitofp %32 : vector<64x256xi32> to vector<64x256xf32>
    %c0_21 = arith.constant 0 : index
    %c0_22 = arith.constant 0 : index
    %c0_23 = arith.constant 0 : index
    %34 = vector.load %arg8[%c0_21, %c0_22, %c0_23] : memref<1x64x128xf32, #tpu.memory_space<vmem>>, vector<1x64x128xf32>
    %35 = vector.shape_cast %34 : vector<1x64x128xf32> to vector<64x128xf32>
    %cst_24 = arith.constant dense<0.000000e+00> : vector<64x128xf32>
    %36 = tpu.matmul %33, %27, %cst_24 {dimension_numbers = #tpu.dot_dimension_numbers<[1], [0], [0], [1], [0, 0, 1, 1], [], []>} : vector<64x256xf32>, vector<256x128xf32>, vector<64x128xf32> -> vector<64x128xf32>
    %37 = arith.addf %35, %36 : vector<64x128xf32>
    %c0_25 = arith.constant 0 : index
    %c0_26 = arith.constant 0 : index
    %c0_27 = arith.constant 0 : index
    %38 = vector.load %arg8[%c0_25, %c0_26, %c0_27] : memref<1x64x128xf32, #tpu.memory_space<vmem>>, vector<1x64x128xf32>
    %39 = vector.shape_cast %38 : vector<1x64x128xf32> to vector<64x128xf32>
    %40 = vector.shape_cast %37 : vector<64x128xf32> to vector<1x64x128xf32>
    tpu.vector_store %arg8[%c0_25, %c0_26, %c0_27], %40 {strides = array<i32>} : memref<1x64x128xf32, #tpu.memory_space<vmem>>, vector<1x64x128xf32>,
    %c1_i32 = arith.constant 1 : i32
    %41 = arith.cmpi eq, %arg1, %c1_i32 : i32
    %42 = arith.extui %41 : i1 to i32
    %c0_i32_28 = arith.constant 0 : i32
    %43 = arith.cmpi ne, %42, %c0_i32_28 : i32
    scf.if %43 {
      %c0_29 = arith.constant 0 : index
      %c0_30 = arith.constant 0 : index
      %c0_31 = arith.constant 0 : index
      %44 = vector.load %arg8[%c0_29, %c0_30, %c0_31] : memref<1x64x128xf32, #tpu.memory_space<vmem>>, vector<1x64x128xf32>
      %45 = vector.shape_cast %44 : vector<1x64x128xf32> to vector<64x128xf32>
      %cst_32 = arith.constant 0.000000e+00 : f32
      %46 = vector.broadcast %cst_32 : f32 to vector<64x128xf32>
      %47 = arith.maximumf %45, %46 : vector<64x128xf32>
      %c0_33 = arith.constant 0 : index
      %c0_34 = arith.constant 0 : index
      %c0_35 = arith.constant 0 : index
      %48 = vector.load %arg8[%c0_33, %c0_34, %c0_35] : memref<1x64x128xf32, #tpu.memory_space<vmem>>, vector<1x64x128xf32>
      %49 = vector.shape_cast %48 : vector<1x64x128xf32> to vector<64x128xf32>
      %50 = vector.shape_cast %47 : vector<64x128xf32> to vector<1x64x128xf32>
      tpu.vector_store %arg8[%c0_33, %c0_34, %c0_35], %50 {strides = array<i32>} : memref<1x64x128xf32, #tpu.memory_space<vmem>>, vector<1x64x128xf32>,
    } else {
    }
    return
  }
  func.func @transform_0(%arg0: i32, %arg1: i32) -> (i32, i32, i32) {
    %c2_i32 = arith.constant 2 : i32
    %0 = arith.muli %arg0, %c2_i32 : i32
    %1 = arith.addi %0, %arg1 : i32
    %c0_i32 = arith.constant 0 : i32
    %c0_i32_0 = arith.constant 0 : i32
    %c0_i32_1 = arith.constant 0 : i32
    return %1, %c0_i32, %c0_i32_0 : i32, i32, i32
  }
  func.func @transform_1(%arg0: i32, %arg1: i32) -> (i32, i32) {
    %c0_i32 = arith.constant 0 : i32
    %c0_i32_0 = arith.constant 0 : i32
    %c0_i32_1 = arith.constant 0 : i32
    return %c0_i32, %c0_i32_0 : i32, i32
  }
  func.func @transform_2(%arg0: i32, %arg1: i32) -> (i32, i32) {
    %c0_i32 = arith.constant 0 : i32
    %c0_i32_0 = arith.constant 0 : i32
    %c0_i32_1 = arith.constant 0 : i32
    return %c0_i32, %c0_i32_0 : i32, i32
  }
  func.func @transform_3(%arg0: i32, %arg1: i32) -> (i32, i32) {
    %c0_i32 = arith.constant 0 : i32
    %c0_i32_0 = arith.constant 0 : i32
    %c0_i32_1 = arith.constant 0 : i32
    return %c0_i32, %c0_i32_0 : i32, i32
  }
  func.func @transform_4(%arg0: i32, %arg1: i32) -> (i32, i32) {
    %c0_i32 = arith.constant 0 : i32
    %c0_i32_0 = arith.constant 0 : i32
    %c0_i32_1 = arith.constant 0 : i32
    return %c0_i32, %c0_i32_0 : i32, i32
  }
  func.func @transform_5(%arg0: i32, %arg1: i32) -> (i32, i32) {
    %c0_i32 = arith.constant 0 : i32
    %c0_i32_0 = arith.constant 0 : i32
    %c0_i32_1 = arith.constant 0 : i32
    return %c0_i32, %c0_i32_0 : i32, i32
  }
  func.func @transform_6(%arg0: i32, %arg1: i32) -> (i32, i32, i32) {
    %c0_i32 = arith.constant 0 : i32
    %c0_i32_0 = arith.constant 0 : i32
    %c0_i32_1 = arith.constant 0 : i32
    return %arg0, %c0_i32, %c0_i32_0 : i32, i32, i32
  }
}

</mosaic_0001>

<bundles_post_ra>
// kernel: tpu_custom_call.1
= control target key start
LH: loop header
LB: loop body
LE: loop exit
PB: predicated region body
PF: predicated region fallthrough
CT: control target
= control target key end

     0   :  { %11 = vsyncpa [#allocation4], 0  ;;  %s2922_s21 = smov 0   ;;  %s2924_s22 = smov 0   ;;  %s3454_s0 = inlined_call_operand.vmem [shape: s32[2,10,256], index: 0, kind: input, shape index: {}]   ;;  %s3455_s1 = inlined_call_operand.vmem [shape: f32[4,1], index: 1, kind: input, shape index: {}]   ;;  %s3456_s2 = inlined_call_operand.vmem [shape: f32[8,128], index: 2, kind: input, shape index: {}]   ;;  %s3457_s3 = inlined_call_operand.vmem [shape: f32[4,128], index: 3, kind: input, shape index: {}]   ;;  %s3458_s4 = inlined_call_operand.vmem [shape: f32[4,128], index: 4, kind: input, shape index: {}]   ;;  %s3459_s5 = inlined_call_operand.vmem [shape: f32[1,128], index: 5, kind: input, shape index: {}]   ;;  %s3460_s6 = inlined_call_operand.hbm [shape: f32[1,64,128], index: 6, kind: output, shape index: {}]  }
   0x1   :  { %s2926_s23 = smov 0  }
   0x2 LB: > { %s2292_s24 = sadd.s32 4294967295, %s2873_s23   ;;  %s26_s25 = sadd.s32 1, %s2869_s22  ;;  %s2873_s23 = sphi %s2926_s23, %s17_s23   ;;  %s2869_s22 = sphi %s2924_s22, %s3525_s22   ;;  %s2865_s21 = sphi %s2922_s21, %s3524_s21  }
   0x3   : > { %p27_p0 = scmp.ge.s32.totalorder %s26_s25, 2  ;;  %p2295_p1 = scmp.ge.s32.totalorder %s2873_s23, 1 }
   0x4   : > { %p233_p2 = scmp.lt.s32.totalorder %s2873_s23, 3 }
   0x5   : > { %s3527_s25 = smov (%p27_p0, %s26_s25), 0 }
   0x6   : > { %p234_p3 = pnand %p2295_p1, %p233_p2 }
   0x8   : > { %237 = sbr.rel (%p234_p3) target bundleno = 1047 (0x417), region = 44 }
   0xd   : > { %p262_p4 = scmp.lt.s32.totalorder %s2865_s21, 1  ;;  %p2298_p5 = scmp.ne.s32.totalorder %s2865_s21, 0 }
   0xf   : > { %s263_s26 = scalar_select %p262_p4, %s2865_s21, 1 }
  0x10   : > { %272 = sbr.rel (%p2298_p5) target bundleno = 31 (0x1f), region = 48 }
  0x11   : > { %s2453_s27 = sshll.u32 %s263_s26, 5 }
  0x12   : > { %s2948_s30 = scalar_lea.vmem %s3454_s0, %s2453_s27 }
  0x15   : > { %v281_v0 = vlaneseq  ;;  %v2875_v1 = vmov 0.0   ;;  %vm290_vm0 = vcmask 7168  }
  0x16   : > { %273 = vst [vmem:[#allocation3] sm:$0xff] %v2875_v1  ;;  %274 = vst [vmem:[#allocation3 + $0x8] sm:$0xff] %v2875_v1 }
  0x17   : > { %275 = vst [vmem:[#allocation3 + $0x10] sm:$0xff] %v2875_v1  ;;  %276 = vst [vmem:[#allocation3 + $0x18] sm:$0xff] %v2875_v1  ;;  %v282_v2 = vshrl.u32 %v281_v0, 7 }
  0x18   : > { %277 = vst [vmem:[#allocation3 + $0x20] sm:$0xff] %v2875_v1  ;;  %278 = vst [vmem:[#allocation3 + $0x28] sm:$0xff] %v2875_v1 }
  0x19   : > { %279 = vst [vmem:[#allocation3 + $0x30] sm:$0xff] %v2875_v1  ;;  %280 = vst [vmem:[#allocation3 + $0x38] sm:$0xff] %v2875_v1  ;;  %v283_v3 = vadd.s32 8, %v282_v2  ;;  %v284_v4 = vadd.s32 16, %v282_v2  ;;  %v285_v5 = vadd.s32 24, %v282_v2  ;;  %v286_v6 = vadd.s32 32, %v282_v2 }
  0x1a   : > { %291 = vst.msk [vmem:[#allocation2] sm:$0xff] %vm290_vm0, %v282_v2  ;;  %v287_v7 = vadd.s32 40, %v282_v2  ;;  %v288_v8 = vadd.s32 48, %v282_v2  ;;  %v289_v9 = vadd.s32 56, %v282_v2 }
  0x1b   : > { %292 = vst.msk [vmem:[#allocation2 + $0x8] sm:$0xff] %vm290_vm0, %v283_v3  ;;  %293 = vst.msk [vmem:[#allocation2 + $0x10] sm:$0xff] %vm290_vm0, %v284_v4 }
  0x1c   : > { %294 = vst.msk [vmem:[#allocation2 + $0x18] sm:$0xff] %vm290_vm0, %v285_v5  ;;  %295 = vst.msk [vmem:[#allocation2 + $0x20] sm:$0xff] %vm290_vm0, %v286_v6 }
  0x1d   : > { %296 = vst.msk [vmem:[#allocation2 + $0x28] sm:$0xff] %vm290_vm0, %v287_v7  ;;  %297 = vst.msk [vmem:[#allocation2 + $0x30] sm:$0xff] %vm290_vm0, %v288_v8 }
  0x1e   : > { %298 = vst.msk [vmem:[#allocation2 + $0x38] sm:$0xff] %vm290_vm0, %v289_v9 }
  0x1f PF: > { %v317_v10 = vld [vmem:[%s3455_s1] sm:$0xf]  ;;  %v2876_v11 = vmov 0   ;;  %v305_v12 = vlaneseq  ;;  %v2300_v14 = vld [vmem:[%s2948_s30 + $0x11] ss:$8 sm:$0x3] }
  0x20   : > { %2812 = vset.pattern.permute.xlu0 %v2876_v11  ;;  %v2299_v18 = vld [vmem:[%s2948_s30 + $0x10] ss:$8 sm:$0x3]  ;;  %v2877_v49 = vmov 2102212464   ;;  %p2448_p6 = scmp.ne.s32.totalorder %s2865_s21, 1 }
  0x21   : > { %320 = vperm.xlu0 %2812, %v317_v10   ;;  %v2963_v13 = vshrl.u32 %v305_v12, 7  ;;  %v2878_v51 = vmov 920167782   ;;  %v2879_v54 = vmov 683565275  }
  0x22   : > { %v2880_v57 = vmov 1326507024   ;;  %v2881_v59 = vmov 2475754826   ;;  %v2882_v61 = vmov 2131351028  }
  0x23   : > { %v307_v15 = vsub.s32 0, %v2963_v13  ;;  %v311_v17 = vsub.s32 1, %v2963_v13 }
  0x25   : > { %v2967_v16 = vrot.slane %v2300_v14, %v307_v15  ;;  %v308_v19 = vrot.slane %v2299_v18, %v307_v15  ;;  %v312_v20 = vrot.slane %v2299_v18, %v311_v17 }
  0x27   : > { %3468 = vst [vmem:[#allocation6_spill] sm:$0xff] %v2967_v16  ;;  %v326_v21 = vrot.slane %v308_v19, %v307_v15  ;;  %v330_v22 = vrot.slane %v312_v20, %v307_v15 }
  0x9c   : > { %v321_v23 = vpop.permute.xlu0 %320 }
  0x9d   : > { %v2973_v24 = vmul.f32 %v326_v21, %v321_v23  ;;  %v2975_v25 = vmul.f32 %v330_v22, %v321_v23 }
  0x9f   : > { %v336_v26 = vand.u32 2139095040, %v2973_v24  ;;  %v440_v27 = vand.u32 2139095040, %v2975_v25  ;;  %v437_v28 = vand.u32 2147483647, %v2975_v25  ;;  %v333_v29 = vand.u32 2147483647, %v2973_v24 }
  0xa0   : > { %vm439_vm15 = vcmp.lt.s32.totalorder %v2975_v25, 0 }
  0xa1   : > { %v337_v30 = vshrl.u32 %v336_v26, 23  ;;  %v441_v31 = vshrl.u32 %v440_v27, 23  ;;  %v444_v32 = vand.u32 8388607, %v437_v28  ;;  %v340_v35 = vand.u32 8388607, %v333_v29 }
  0xa2   : > { %vm438_vm0 = vcmp.le.f32.partialorder %v437_v28, 0.7853982 }
  0xa3   : > { %v2301_v33 = vadd.s32 4294967169, %v337_v30  ;;  %v2305_v34 = vadd.s32 4294967169, %v441_v31  ;;  %v445_v38 = vor.u32 8388608, %v444_v32  ;;  %v341_v39 = vor.u32 8388608, %v340_v35 }
  0xa5   : > { %v343_v36 = vadd.s32 1, %v2301_v33  ;;  %v447_v37 = vadd.s32 1, %v2305_v34  ;;  %v2985_v44 = vshll.u32 %v445_v38, 8  ;;  %v2989_v48 = vshll.u32 %v341_v39, 8 }
  0xa7   : > { %vm344_vm1 = vcmp.gt.s32.totalorder %v343_v36, 0  ;;  %vm448_vm2 = vcmp.gt.s32.totalorder %v447_v37, 0 }
  0xa8   : > { %v345_v40 = vsel %vm344_vm1, %v343_v36, 0  ;;  %v449_v41 = vsel %vm448_vm2, %v447_v37, 0  ;;  %vm335_vm1 = vcmp.lt.s32.totalorder %v2973_v24, 0  ;;  %vm334_vm2 = vcmp.le.f32.partialorder %v333_v29, 0.7853982 }
  0xa9   : > { %v347_v42 = vand.u32 31, %v345_v40  ;;  %v451_v43 = vand.u32 31, %v449_v41  ;;  %v2987_v45 = vshrl.u32 %v345_v40, 5  ;;  %v450_v47 = vshrl.u32 %v449_v41, 5 }
  0xab   : > { %v348_v46 = vsub.s32 32, %v347_v42  ;;  %v359_v50 = vshll.u32 %v2877_v49, %v347_v42  ;;  %v362_v52 = vshll.u32 %v2878_v51, %v347_v42  ;;  %v452_v53 = vsub.s32 32, %v451_v43 }
  0xac   : > { %v454_v55 = vshll.u32 %v2879_v54, %v451_v43  ;;  %v457_v60 = vshll.u32 %v2881_v59, %v451_v43  ;;  %v460_v62 = vshll.u32 %v2882_v61, %v451_v43  ;;  %v463_v2 = vshll.u32 %v2877_v49, %v451_v43 }
  0xad   : > { %v360_v56 = vshrl.u32 %v2878_v51, %v348_v46  ;;  %v363_v58 = vshrl.u32 %v2880_v57, %v348_v46  ;;  %v455_v63 = vshrl.u32 %v2881_v59, %v452_v53  ;;  %v458_v0 = vshrl.u32 %v2882_v61, %v452_v53 }
  0xae   : > { %v461_v1 = vshrl.u32 %v2877_v49, %v452_v53  ;;  %v453_v3 = vshrl.u32 %v2879_v54, %v452_v53  ;;  %v464_v4 = vshrl.u32 %v2878_v51, %v452_v53  ;;  %v466_v5 = vshll.u32 %v2878_v51, %v451_v43 }
  0xaf   : > { %v467_v6 = vshrl.u32 %v2880_v57, %v452_v53  ;;  %v361_v7 = vor.u32 %v360_v56, %v359_v50  ;;  %v456_v8 = vor.u32 %v455_v63, %v454_v55  ;;  %v459_v9 = vor.u32 %v458_v0, %v457_v60 }
  0xb0   : > { %v462_v10 = vor.u32 %v461_v1, %v460_v62  ;;  %v364_v12 = vor.u32 %v363_v58, %v362_v52  ;;  %v465_v14 = vor.u32 %v464_v4, %v463_v2  ;;  %vm469_vm3 = vcmp.lt.s32.totalorder %v450_v47, 1 }
  0xb1   : > { %v468_v15 = vor.u32 %v467_v6, %v466_v5  ;;  %vm368_vm4 = vcmp.lt.s32.totalorder %v2987_v45, 4  ;;  %vm471_vm5 = vcmp.lt.s32.totalorder %v450_v47, 3  ;;  %vm472_vm6 = vcmp.lt.s32.totalorder %v450_v47, 4 }
  0xb2   : > { %v473_v18 = vsel %vm469_vm3, %v453_v3, %v456_v8  ;;  %v474_v19 = vsel %vm472_vm6, %v462_v10, 2102212464  ;;  %v477_v20 = vsel %vm469_vm3, %v456_v8, %v459_v9  ;;  %v478_v21 = vsel %vm472_vm6, %v465_v14, 920167782 }
  0xb3   : > { %v481_v22 = vsel %vm469_vm3, %v459_v9, %v462_v10  ;;  %vm470_vm7 = vcmp.lt.s32.totalorder %v450_v47, 2  ;;  %v475_v23 = vsel %vm471_vm5, %v459_v9, %v474_v19  ;;  %v479_v26 = vsel %vm471_vm5, %v462_v10, %v478_v21 }
  0xb4   : > { %v482_v27 = vsel %vm472_vm6, %v468_v15, 1326507024  ;;  %v374_v30 = vsel %vm368_vm4, %v361_v7, 920167782  ;;  %v378_v31 = vsel %vm368_vm4, %v364_v12, 1326507024  ;;  %v480_v32 = vsel %vm470_vm7, %v477_v20, %v479_v26 }
  0xb5   : > { %v483_v33 = vsel %vm471_vm5, %v465_v14, %v482_v27  ;;  %v476_v34 = vsel %vm470_vm7, %v473_v18, %v475_v23  ;;  %v2997_v36 = vmul.u32.u64.low %v2985_v44, %v480_v32  ;;  %v2998_v37 = vmul.u32.u64.high %v2985_v44, %v480_v32, %v2997_v36 }
  0xb6   : > { %v484_v35 = vsel %vm470_vm7, %v481_v22, %v483_v33  ;;  %v350_v40 = vshll.u32 %v2879_v54, %v347_v42  ;;  %v351_v41 = vshrl.u32 %v2881_v59, %v348_v46  ;;  %v353_v43 = vshll.u32 %v2881_v59, %v347_v42 }
  0xb7   : > { %v3001_v38 = vmul.u32.u64.low %v2985_v44, %v484_v35  ;;  %v3002_v39 = vmul.u32.u64.high %v2985_v44, %v484_v35, %v3001_v38  ;;  %v354_v47 = vshrl.u32 %v2882_v61, %v348_v46  ;;  %v356_v50 = vshll.u32 %v2882_v61, %v347_v42 }
  0xb8   : > { %v357_v51 = vshrl.u32 %v2877_v49, %v348_v46  ;;  %v492_v52 = vmul.u32 %v2985_v44, %v476_v34  ;;  %v349_v53 = vshrl.u32 %v2879_v54, %v348_v46  ;;  %v352_v55 = vor.u32 %v351_v41, %v350_v40 }
  0xb9   : > { %vm365_vm8 = vcmp.lt.s32.totalorder %v2987_v45, 1  ;;  %v495_v56 = vadd.s32 1, %v2998_v37  ;;  %v355_v57 = vor.u32 %v354_v47, %v353_v43  ;;  %vm367_vm9 = vcmp.lt.s32.totalorder %v2987_v45, 3 }
  0xba   : > { %v358_v58 = vor.u32 %v357_v51, %v356_v50  ;;  %vm494_vm10 = vc.u32 %v3002_v39, %v2997_v36  ;;  %vm366_vm11 = vcmp.lt.s32.totalorder %v2987_v45, 2  ;;  %v369_v42 = vsel %vm365_vm8, %v349_v53, %v352_v55 }
  0xbb   : > { %v379_v49 = vsel %vm367_vm9, %v361_v7, %v378_v31  ;;  %v496_v44 = vsel %vm494_vm10, %v495_v56, %v2998_v37  ;;  %v373_v54 = vsel %vm365_vm8, %v352_v55, %v355_v57  ;;  %v493_v31 = vadd.s32 %v2997_v36, %v3002_v39 }
  0xbc   : > { %v370_v46 = vsel %vm368_vm4, %v358_v58, 2102212464  ;;  %v375_v59 = vsel %vm367_vm9, %v358_v58, %v374_v30  ;;  %v497_v60 = vadd.s32 %v496_v44, %v492_v52  ;;  %v377_v63 = vsel %vm365_vm8, %v355_v57, %v358_v58 }
  0xbd   : > { %v371_v61 = vsel %vm367_vm9, %v355_v57, %v370_v46  ;;  %v376_v62 = vsel %vm366_vm11, %v373_v54, %v375_v59  ;;  %v380_v0 = vsel %vm366_vm11, %v377_v63, %v379_v49  ;;  %vm529_vm9 = vweird.f32 %v2975_v25 }
  0xbe   : > { %v3020_v1 = vmul.u32.u64.low %v2989_v48, %v376_v62  ;;  %v3021_v2 = vmul.u32.u64.high %v2989_v48, %v376_v62, %v3020_v1  ;;  %v498_v3 = vadd.s32 536870912, %v497_v60  ;;  %v372_v6 = vsel %vm366_vm11, %v369_v42, %v371_v61 }
  0xbf   : > { %v3024_v4 = vmul.u32.u64.low %v2989_v48, %v380_v0  ;;  %v3025_v5 = vmul.u32.u64.high %v2989_v48, %v380_v0, %v3024_v4  ;;  %v388_v10 = vmul.u32 %v2989_v48, %v372_v6 }
  0xc0   : > { %v499_v7 = vshrl.u32 %v498_v3, 30  ;;  %v391_v8 = vadd.s32 1, %v3021_v2 }
  0xc1   : > { %vm390_vm12 = vc.u32 %v3025_v5, %v3020_v1  ;;  %v389_v53 = vadd.s32 %v3020_v1, %v3025_v5 }
  0xc2   : > { %v500_v9 = vshll.u32 %v499_v7, 30  ;;  %v392_v45 = vsel %vm390_vm12, %v391_v8, %v3021_v2  ;;  %v523_v49 = vsub.s32 4, %v499_v7 }
  0xc3   : > { %v393_v14 = vadd.s32 %v392_v45, %v388_v10 }
  0xc4   : > { %v501_v12 = vsub.s32 %v497_v60, %v500_v9  ;;  %v524_v61 = vsel %vm439_vm15, %v523_v49, %v499_v7 }
  0xc5   : > { %v394_v18 = vadd.s32 536870912, %v393_v14  ;;  %v526_v1 = vsel %vm438_vm0, 0, %v524_v61 }
  0xc6   : > { %v503_v15 = vsub.s32 0, %v501_v12  ;;  %v530_v4 = vadd.s32 3, %v526_v1  ;;  %v737_v8 = vand.u32 3, %v526_v1 }
  0xc7   : > { %v395_v20 = vshrl.u32 %v394_v18, 30 }
  0xc8   : > { %v2306_v19 = vmin.u32 %v503_v15, %v501_v12  ;;  %v531_v7 = vand.u32 3, %v530_v4  ;;  %vm739_vm4 = vcmp.eq.s32.totalorder %v737_v8, 0  ;;  %vm742_vm5 = vcmp.eq.s32.totalorder %v737_v8, 2 }
  0xc9   : > { %v396_v22 = vshll.u32 %v395_v20, 30  ;;  %v419_v3 = vsub.s32 4, %v395_v20  ;;  %vm738_vm8 = vcmp.lt.s32.totalorder %v737_v8, 2 }
  0xca   : > { %v505_v21 = vclz %v2306_v19  ;;  %vm536_vm3 = vcmp.eq.s32.totalorder %v531_v7, 2  ;;  %vm533_vm6 = vcmp.eq.s32.totalorder %v531_v7, 0  ;;  %vm532_vm7 = vcmp.lt.s32.totalorder %v531_v7, 2 }
  0xcb   : > { %v397_v26 = vsub.s32 %v393_v14, %v396_v22  ;;  %v420_v6 = vsel %vm335_vm1, %v419_v3, %v395_v20 }
  0xcc   : > { %v2307_v23 = vadd.s32 4294967294, %v505_v21  ;;  %v422_v10 = vsel %vm334_vm2, 0, %v420_v6 }
  0xcd   : > { %v399_v30 = vsub.s32 0, %v397_v26  ;;  %v426_v18 = vadd.s32 3, %v422_v10 }
  0xce   : > { %vm2308_vm13 = vcmp.lt.s32.totalorder %v2307_v23, 0 }
  0xcf   : > { %v508_v27 = vsel %vm2308_vm13, 0, %v2307_v23  ;;  %v2302_v33 = vmin.u32 %v399_v30, %v397_v26  ;;  %v634_v30 = vand.u32 3, %v422_v10 }
  0xd0   : > { %v509_v48 = vsub.s32 32, %v508_v27  ;;  %v513_v32 = vsub.s32 4294967266, %v508_v27  ;;  %v510_v34 = vshll.u32 %v501_v12, %v508_v27  ;;  %v427_v27 = vand.u32 3, %v426_v18 }
  0xd1   : > { %v401_v38 = vclz %v2302_v33  ;;  %vm636_vm11 = vcmp.eq.s32.totalorder %v634_v30, 0  ;;  %vm639_vm12 = vcmp.eq.s32.totalorder %v634_v30, 2 }
  0xd2   : > { %v511_v35 = vshrl.u32 %v493_v31, %v509_v48  ;;  %v514_v37 = vadd.s32 127, %v513_v32  ;;  %vm432_vm10 = vcmp.eq.s32.totalorder %v427_v27, 2  ;;  %vm429_vm13 = vcmp.eq.s32.totalorder %v427_v27, 0 }
  0xd3   : > { %v2303_v43 = vadd.s32 4294967294, %v401_v38 }
  0xd4   : > { %v512_v40 = vor.u32 %v511_v35, %v510_v34  ;;  %v515_v41 = vshll.u32 %v514_v37, 23 }
  0xd5   : > { %vm2304_vm14 = vcmp.lt.s32.totalorder %v2303_v43, 0 }
  0xd6   : > { %v516_v47 = vor.u32 4788187, %v515_v41  ;;  %v519_v51 = vcvt.s32.f32 %v512_v40  ;;  %v404_v52 = vsel %vm2304_vm14, 0, %v2303_v43  ;;  %vm910_vm14 = vcmask 1043456  }
  0xd7   : > { %v405_v55 = vsub.s32 32, %v404_v52  ;;  %v409_v56 = vsub.s32 4294967266, %v404_v52  ;;  %v406_v39 = vshll.u32 %v397_v26, %v404_v52  ;;  %v300_v52 = vld [vmem:[%s2948_s30 + $0x8] sm:$0xff] }
  0xd8   : > { %v517_v50 = vand.u32 2147483647, %v516_v47  ;;  %v299_v47 = vld [vmem:[%s2948_s30] sm:$0xff] }
  0xd9   : > { %v407_v57 = vshrl.u32 %v389_v53, %v405_v55  ;;  %v410_v58 = vadd.s32 127, %v409_v56 }
  0xda   : > { %v520_v36 = vmul.f32 %v519_v51, %v517_v50  ;;  %v747_v51 = vld [vmem:[%s3456_s2] sm:$0xff] }
  0xdb   : > { %v408_v44 = vor.u32 %v407_v57, %v406_v39  ;;  %v411_v46 = vshll.u32 %v410_v58, 23 }
  0xdc   : > { %v521_v42 = vxor.u32 2147483648, %v520_v36 }
  0xdd   : > { %v412_v60 = vor.u32 4788187, %v411_v46  ;;  %v415_v63 = vcvt.s32.f32 %v408_v44 }
  0xde   : > { %v522_v54 = vsel %vm439_vm15, %v521_v42, %v520_v36  ;;  %vm428_vm15 = vcmp.lt.s32.totalorder %v427_v27, 2 }
  0xdf   : > { %v525_v59 = vsel %vm438_vm0, %v2975_v25, %v522_v54  ;;  %v413_v62 = vand.u32 2147483647, %v412_v60  ;;  %v748_v25 = vld [vmem:[%s3457_s3] sm:$0xf]  ;;  %vm635_vm0 = vcmp.lt.s32.totalorder %v634_v30, 2 }
  0xe0   : > { %2814 = vcosq.f32 %v525_v59  ;;  %2609 = vmatprep.subr.msk.mxu0 %vm910_vm14, %v748_v25  ;;  %2759 = vmatprep.subr.msk.mxu1 %vm910_vm14, %v748_v25 }
  0xe1   : > { %2816 = vsinq.f32 %v525_v59  ;;  %v416_v0 = vmul.f32 %v415_v63, %v413_v62  ;;  %2610 = vmatpush3.msk.msra.mxu0 %vm910_vm14, %v748_v25  ;;  %2760 = vmatpush3.msk.msra.mxu1 %vm910_vm14, %v748_v25 }
  0xe2   : > { %2659 = vmatprep.subr.mxu1 %v747_v51 }
  0xe3   : > { %v417_v2 = vxor.u32 2147483648, %v416_v0 }
  0xe5   : > { %v418_v28 = vsel %vm335_vm1, %v417_v2, %v416_v0  ;;  %vm425_vm1 = vweird.f32 %v2973_v24 }
  0xe6   : > { %v421_v5 = vsel %vm334_vm2, %v2973_v24, %v418_v28  ;;  %v1525_v24 = vld [vmem:[%s3458_s4] sm:$0xf]  ;;  %vm813_vm2 = vcmask 31744  }
  0xe7   : > { %2818 = vcosq.f32 %v421_v5  ;;  %2709 = vmatprep.subr.msk.mxu0 %vm910_vm14, %v1525_v24 }
  0xe8   : > { %2820 = vsinq.f32 %v421_v5 }
  0xed   : > { %v2815_v9 = vpop.eup %2814 }
  0xee   : > { %v2817_v45 = vpop.eup %2816  ;;  %v537_v12 = vxor.u32 2147483648, %v2815_v9 }
  0xef   : > { %v534_v14 = vxor.u32 2147483648, %v2817_v45 }
  0xf0   : > { %v538_v15 = vsel %vm536_vm3, %v537_v12, %v2817_v45  ;;  %v744_v29 = vsel %vm742_vm5, %v537_v12, %v2817_v45  ;;  %vm1203_vm3 = vcmask 64512  }
  0xf1   : > { %v535_v19 = vsel %vm533_vm6, %v2815_v9, %v534_v14  ;;  %v741_v21 = vsel %vm739_vm4, %v2815_v9, %v534_v14 }
  0xf2   : > { %v539_v20 = vsel %vm532_vm7, %v535_v19, %v538_v15  ;;  %v745_v22 = vsel %vm738_vm8, %v741_v21, %v744_v29 }
  0xf3   : > { %v540_v23 = vsel %vm529_vm9, nan, %v539_v20  ;;  %v746_v26 = vsel %vm529_vm9, nan, %v745_v22 }
  0xf4   : > { %781 = vxpose.xlu1.b32.start.end [1/1] (short) %v540_v23, 128  ;;  %v2819_v31 = vpop.eup %2818 }
  0xf5   : > { %v2821_v48 = vpop.eup %2820  ;;  %v433_v32 = vxor.u32 2147483648, %v2819_v31 }
  0xf6   : > { %v430_v33 = vxor.u32 2147483648, %v2821_v48 }
  0xf7   : > { %v434_v34 = vsel %vm432_vm10, %v433_v32, %v2821_v48  ;;  %v641_v35 = vsel %vm639_vm12, %v433_v32, %v2821_v48 }
  0xf8   : > { %v431_v37 = vsel %vm429_vm13, %v2819_v31, %v430_v33  ;;  %v638_v38 = vsel %vm636_vm11, %v2819_v31, %v430_v33 }
  0xf9   : > { %v435_v40 = vsel %vm428_vm15, %v431_v37, %v434_v34  ;;  %v642_v41 = vsel %vm635_vm0, %v638_v38, %v641_v35  ;;  %v1986_v38 = vld [vmem:[#allocation2 + $0x8] sm:$0xff] }
  0xfa   : > { %v436_v43 = vsel %vm425_vm1, nan, %v435_v40  ;;  %v643_v50 = vsel %vm425_vm1, nan, %v642_v41 }
  0xfb   : > { %749 = vxpose.xlu0.b32.start.end [1/1] (short) %v436_v43, 128 }
 0x131   : > { %1139 = vxpose.xlu1.b32.start.end [1/1] (short) %v299_v47, 128 }
 0x138   : > { %1526 = vxpose.xlu0.b32.start.end [1/1] (short) %v643_v50, 128 }
 0x16e   : > { %1171 = vxpose.xlu1.b32.start.end [1/1] (short) %v300_v52, 128 }
 0x170   : > { %v3059_v53 = vpop.trf.xlu1 }
 0x174   : > { %v3061_v55 = vpop.trf.xlu1 }
 0x175   : > { %1558 = vxpose.xlu0.b32.start.end [1/1] (short) %v746_v26, 128 }
 0x177   : > { %v765_v36 = vpop.trf.xlu0 }
 0x178   : > { %v3063_v56 = vpop.trf.xlu1  ;;  %2611 = vmatprep.mubr.msk.f32.mxu0 %vm813_vm2, %v765_v36 }
 0x17b   : > { %v766_v57 = vpop.trf.xlu0 }
 0x17c   : > { %v3066_v39 = vpop.trf.xlu1  ;;  %2612 = vmatmul.mubr.msk.f32.vlgmr.msra.gmra.mxu0 %vm813_vm2, %v766_v57 }
 0x17d   : > { %2710 = vmatpush3.msk.msra.mxu0 %vm910_vm14, %v1525_v24 }
 0x17f   : > { %v767_v42 = vpop.trf.xlu0 }
 0x180   : > { %v3070_v58 = vpop.trf.xlu1  ;;  %2614 = vmatprep.mubr.msk.f32.mxu0 %vm813_vm2, %v767_v42 }
 0x183   : > { %v768_v44 = vpop.trf.xlu0 }
 0x184   : > { %v3073_v49 = vpop.trf.xlu1  ;;  %2615 = vmatmul.mubr.msk.f32.gmra.mxu0 %vm813_vm2, %v768_v44 }
 0x187   : > { %v769_v54 = vpop.trf.xlu0 }
 0x188   : > { %v3076_v46 = vpop.trf.xlu1  ;;  %2617 = vmatprep.mubr.msk.f32.mxu0 %vm813_vm2, %v769_v54 }
 0x18b   : > { %v770_v60 = vpop.trf.xlu0 }
 0x18c   : > { %v3079_v59 = vpop.trf.xlu1  ;;  %2813 = vset.pattern.permute.xlu1 %v2876_v11  ;;  %2618 = vmatmul.mubr.msk.f32.gmra.mxu0 %vm813_vm2, %v770_v60 }
 0x18f   : > { %v771_v62 = vpop.trf.xlu0 }
 0x190   : > { %v805_v61 = vpop.trf.xlu1  ;;  %2620 = vmatprep.mubr.msk.f32.mxu0 %vm813_vm2, %v771_v62  ;;  %v1985_v62 = vld [vmem:[#allocation2] sm:$0xff] }
 0x191   : > { %2647 = vmatprep.mubr.msk.f32.mxu1 %vm813_vm2, %v805_v61 }
 0x193   : > { %v772_v0 = vpop.trf.xlu0 }
 0x194   : > { %v806_v63 = vpop.trf.xlu1  ;;  %2621 = vmatmul.mubr.msk.f32.gmra.mxu0 %vm813_vm2, %v772_v0 }
 0x195   : > { %2648 = vmatmul.mubr.msk.f32.vlgmr.msra.gmra.mxu1 %vm813_vm2, %v806_v63 }
 0x196   : > { %2660 = vmatpush3.msra.mxu1 %v747_v51 }
 0x197   : > { %v773_v2 = vpop.trf.xlu0 }
 0x198   : > { %v807_v1 = vpop.trf.xlu1  ;;  %2623 = vmatprep.mubr.msk.f32.mxu0 %vm813_vm2, %v773_v2 }
 0x199   : > { %2650 = vmatprep.mubr.msk.f32.mxu1 %vm813_vm2, %v807_v1  ;;  %v1987_v1 = vld [vmem:[#allocation2 + $0x10] sm:$0xff] }
 0x19b   : > { %v774_v3 = vpop.trf.xlu0 }
 0x19c   : > { %v808_v11 = vpop.trf.xlu1  ;;  %2624 = vmatmul.mubr.msk.f32.gmra.mxu0 %vm813_vm2, %v774_v3  ;;  %v1988_v3 = vld [vmem:[#allocation2 + $0x18] sm:$0xff] }
 0x19d   : > { %2651 = vmatmul.mubr.msk.f32.gmra.mxu1 %vm813_vm2, %v808_v11 }
 0x19f   : > { %v775_v28 = vpop.trf.xlu0 }
 0x1a0   : > { %v809_v4 = vpop.trf.xlu1  ;;  %2626 = vmatprep.mubr.msk.f32.mxu0 %vm813_vm2, %v775_v28 }
 0x1a1   : > { %2653 = vmatprep.mubr.msk.f32.mxu1 %vm813_vm2, %v809_v4 }
 0x1a3   : > { %v776_v6 = vpop.trf.xlu0 }
 0x1a4   : > { %v810_v5 = vpop.trf.xlu1  ;;  %2627 = vmatmul.mubr.msk.f32.gmra.mxu0 %vm813_vm2, %v776_v6 }
 0x1a5   : > { %2654 = vmatmul.mubr.msk.f32.gmra.mxu1 %vm813_vm2, %v810_v5  ;;  %v1989_v5 = vld [vmem:[#allocation2 + $0x20] sm:$0xff] }
 0x1a7   : > { %v777_v8 = vpop.trf.xlu0 }
 0x1a8   : > { %v811_v7 = vpop.trf.xlu1  ;;  %2629 = vmatprep.mubr.msk.f32.mxu0 %vm813_vm2, %v777_v8  ;;  %v1990_v8 = vld [vmem:[#allocation2 + $0x28] sm:$0xff] }
 0x1a9   : > { %2656 = vmatprep.mubr.msk.f32.mxu1 %vm813_vm2, %v811_v7 }
 0x1ab   : > { %v778_v10 = vpop.trf.xlu0 }
 0x1ac   : > { %v812_v9 = vpop.trf.xlu1  ;;  %2630 = vmatmul.mubr.msk.f32.gmra.mxu0 %vm813_vm2, %v778_v10 }
 0x1ad   : > { %2657 = vmatmul.mubr.msk.f32.gmra.mxu1 %vm813_vm2, %v812_v9 }
 0x1af   : > { %v779_v12 = vpop.trf.xlu0 }
 0x1b0   : > { %v1155_v45 = vpop.trf.xlu1  ;;  %2632 = vmatprep.mubr.msk.f32.mxu0 %vm813_vm2, %v779_v12 }
 0x1b1   : > { %2661 = vmatprep.mubr.msk.f32.mxu1 %vm1203_vm3, %v1155_v45  ;;  %v1991_v45 = vld [vmem:[#allocation2 + $0x30] sm:$0xff] }
 0x1b3   : > { %v780_v15 = vpop.trf.xlu0 }
 0x1b4   : > { %v1156_v14 = vpop.trf.xlu1  ;;  %2633 = vmatmul.mubr.msk.f32.gmra.mxu0 %vm813_vm2, %v780_v15  ;;  %v1992_v15 = vld [vmem:[#allocation2 + $0x38] sm:$0xff] }
 0x1b5   : > { %2662 = vmatmul.mubr.msk.f32.vlgmr.msra.gmra.mxu1 %vm1203_vm3, %v1156_v14  ;;  %2635 = vmatprep.mubr.msk.f32.mxu0 %vm813_vm2, %v3059_v53 }
 0x1b7   : > { %v1542_v29 = vpop.trf.xlu0 }
 0x1b8   : > { %v1157_v18 = vpop.trf.xlu1  ;;  %2636 = vmatmul.mubr.msk.f32.gmra.mxu0 %vm813_vm2, %v3061_v55 }
 0x1b9   : > { %2664 = vmatprep.mubr.msk.f32.mxu1 %vm1203_vm3, %v1157_v18  ;;  %2638 = vmatprep.mubr.msk.f32.mxu0 %vm813_vm2, %v3063_v56 }
 0x1bb   : > { %v1543_v21 = vpop.trf.xlu0 }
 0x1bc   : > { %v1158_v19 = vpop.trf.xlu1  ;;  %2639 = vmatmul.mubr.msk.f32.gmra.mxu0 %vm813_vm2, %v3066_v39 }
 0x1bd   : > { %2665 = vmatmul.mubr.msk.f32.gmra.mxu1 %vm1203_vm3, %v1158_v19  ;;  %2641 = vmatprep.mubr.msk.f32.mxu0 %vm813_vm2, %v3070_v58 }
 0x1bf   : > { %v1544_v22 = vpop.trf.xlu0 }
 0x1c0   : > { %v1159_v20 = vpop.trf.xlu1  ;;  %2642 = vmatmul.mubr.msk.f32.gmra.mxu0 %vm813_vm2, %v3073_v49 }
 0x1c1   : > { %2667 = vmatprep.mubr.msk.f32.mxu1 %vm1203_vm3, %v1159_v20  ;;  %2644 = vmatprep.mubr.msk.f32.mxu0 %vm813_vm2, %v3076_v46 }
 0x1c3   : > { %v1545_v26 = vpop.trf.xlu0 }
 0x1c4   : > { %v1160_v23 = vpop.trf.xlu1  ;;  %2645 = vmatmul.mubr.msk.f32.gmra.mxu0 %vm813_vm2, %v3079_v59 }
 0x1c5   : > { %2668 = vmatmul.mubr.msk.f32.gmra.mxu1 %vm1203_vm3, %v1160_v23  ;;  %2711 = vmatprep.mubr.msk.f32.mxu0 %vm813_vm2, %v1542_v29 }
 0x1c7   : > { %v1546_v30 = vpop.trf.xlu0 }
 0x1c8   : > { %v1161_v27 = vpop.trf.xlu1  ;;  %2712 = vmatmul.mubr.msk.f32.vlgmr.msra.gmra.mxu0 %vm813_vm2, %v1543_v21  ;;  %1994 = vperm.xlu1 %2813, %v1985_v62  }
 0x1c9   : > { %2670 = vmatprep.mubr.msk.f32.mxu1 %vm1203_vm3, %v1161_v27  ;;  %2714 = vmatprep.mubr.msk.f32.mxu0 %vm813_vm2, %v1544_v22 }
 0x1cb   : > { %v1547_v48 = vpop.trf.xlu0 }
 0x1cc   : > { %v1162_v31 = vpop.trf.xlu1  ;;  %2715 = vmatmul.mubr.msk.f32.gmra.mxu0 %vm813_vm2, %v1545_v26  ;;  %2000 = vperm.xlu1 %2813, %v1987_v1  }
 0x1cd   : > { %2671 = vmatmul.mubr.msk.f32.gmra.mxu1 %vm1203_vm3, %v1162_v31  ;;  %2717 = vmatprep.mubr.msk.f32.mxu0 %vm813_vm2, %v1546_v30 }
 0x1cf   : > { %v1548_v33 = vpop.trf.xlu0 }
 0x1d0   : > { %v1163_v32 = vpop.trf.xlu1  ;;  %2718 = vmatmul.mubr.msk.f32.gmra.mxu0 %vm813_vm2, %v1547_v48  ;;  %2003 = vperm.xlu1 %2813, %v1988_v3  }
 0x1d1   : > { %2673 = vmatprep.mubr.msk.f32.mxu1 %vm1203_vm3, %v1163_v32  ;;  %2720 = vmatprep.mubr.msk.f32.mxu0 %vm813_vm2, %v1548_v33 }
 0x1d3   : > { %v1549_v35 = vpop.trf.xlu0 }
 0x1d4   : > { %v1164_v34 = vpop.trf.xlu1  ;;  %2721 = vmatmul.mubr.msk.f32.gmra.mxu0 %vm813_vm2, %v1549_v35  ;;  %2006 = vperm.xlu1 %2813, %v1989_v5  }
 0x1d5   : > { %2674 = vmatmul.mubr.msk.f32.gmra.mxu1 %vm1203_vm3, %v1164_v34 }
 0x1d7   : > { %v1550_v37 = vpop.trf.xlu0 }
 0x1d8   : > { %v1165_v25 = vpop.trf.xlu1  ;;  %2723 = vmatprep.mubr.msk.f32.mxu0 %vm813_vm2, %v1550_v37  ;;  %2009 = vperm.xlu1 %2813, %v1990_v8  }
 0x1d9   : > { %2676 = vmatprep.mubr.msk.f32.mxu1 %vm1203_vm3, %v1165_v25 }
 0x1da   : > { %1997 = vperm.xlu0 %2812, %v1986_v38  }
 0x1db   : > { %v1551_v41 = vpop.trf.xlu0 }
 0x1dc   : > { %v1166_v40 = vpop.trf.xlu1  ;;  %2724 = vmatmul.mubr.msk.f32.gmra.mxu0 %vm813_vm2, %v1551_v41  ;;  %2012 = vperm.xlu1 %2813, %v1991_v45  }
 0x1dd   : > { %2677 = vmatmul.mubr.msk.f32.gmra.mxu1 %vm1203_vm3, %v1166_v40 }
 0x1df   : > { %v1552_v47 = vpop.trf.xlu0 }
 0x1e0   : > { %v1167_v43 = vpop.trf.xlu1  ;;  %2726 = vmatprep.mubr.msk.f32.mxu0 %vm813_vm2, %v1552_v47  ;;  %2015 = vperm.xlu1 %2813, %v1992_v15  }
 0x1e1   : > { %2679 = vmatprep.mubr.msk.f32.mxu1 %vm1203_vm3, %v1167_v43 }
 0x1e3   : > { %v1553_v51 = vpop.trf.xlu0 }
 0x1e4   : > { %v1168_v50 = vpop.trf.xlu1  ;;  %2727 = vmatmul.mubr.msk.f32.gmra.mxu0 %vm813_vm2, %v1553_v51 }
 0x1e5   : > { %2680 = vmatmul.mubr.msk.f32.gmra.mxu1 %vm1203_vm3, %v1168_v50 }
 0x1e7   : > { %v1554_v52 = vpop.trf.xlu0 }
 0x1e8   : > { %v1169_v24 = vpop.trf.xlu1  ;;  %2729 = vmatprep.mubr.msk.f32.mxu0 %vm813_vm2, %v1554_v52 }
 0x1e9   : > { %2682 = vmatprep.mubr.msk.f32.mxu1 %vm1203_vm3, %v1169_v24 }
 0x1eb   : > { %v1555_v55 = vpop.trf.xlu0 }
 0x1ec   : > { %v1170_v53 = vpop.trf.xlu1  ;;  %2730 = vmatmul.mubr.msk.f32.gmra.mxu0 %vm813_vm2, %v1555_v55 }
 0x1ed   : > { %2683 = vmatmul.mubr.msk.f32.gmra.mxu1 %vm1203_vm3, %v1170_v53 }
 0x1ef   : > { %v1556_v36 = vpop.trf.xlu0 }
 0x1f0   : > { %v1187_v56 = vpop.trf.xlu1  ;;  %2732 = vmatprep.mubr.msk.f32.mxu0 %vm813_vm2, %v1556_v36 }
 0x1f1   : > { %2685 = vmatprep.mubr.msk.f32.mxu1 %vm1203_vm3, %v1187_v56 }
 0x1f3   : > { %v1557_v57 = vpop.trf.xlu0 }
 0x1f4   : > { %v1188_v39 = vpop.trf.xlu1  ;;  %2733 = vmatmul.mubr.msk.f32.gmra.mxu0 %vm813_vm2, %v1557_v57 }
 0x1f5   : > { %2686 = vmatmul.mubr.msk.f32.gmra.mxu1 %vm1203_vm3, %v1188_v39 }
 0x1f7   : > { %v1574_v42 = vpop.trf.xlu0 }
 0x1f8   : > { %v1189_v58 = vpop.trf.xlu1  ;;  %2735 = vmatprep.mubr.msk.f32.mxu0 %vm813_vm2, %v1574_v42 }
 0x1f9   : > { %2688 = vmatprep.mubr.msk.f32.mxu1 %vm1203_vm3, %v1189_v58 }
 0x1fb   : > { %v1575_v44 = vpop.trf.xlu0 }
 0x1fc   : > { %v1190_v49 = vpop.trf.xlu1  ;;  %2736 = vmatmul.mubr.msk.f32.gmra.mxu0 %vm813_vm2, %v1575_v44 }
 0x1fd   : > { %2689 = vmatmul.mubr.msk.f32.gmra.mxu1 %vm1203_vm3, %v1190_v49 }
 0x1ff   : > { %v1576_v54 = vpop.trf.xlu0 }
 0x200   : > { %v1191_v46 = vpop.trf.xlu1  ;;  %2738 = vmatprep.mubr.msk.f32.mxu0 %vm813_vm2, %v1576_v54 }
 0x201   : > { %2691 = vmatprep.mubr.msk.f32.mxu1 %vm1203_vm3, %v1191_v46 }
 0x203   : > { %v1577_v60 = vpop.trf.xlu0 }
 0x204   : > { %v1192_v59 = vpop.trf.xlu1  ;;  %2739 = vmatmul.mubr.msk.f32.gmra.mxu0 %vm813_vm2, %v1577_v60 }
 0x205   : > { %2692 = vmatmul.mubr.msk.f32.gmra.mxu1 %vm1203_vm3, %v1192_v59 }
 0x207   : > { %v1578_v63 = vpop.trf.xlu0 }
 0x208   : > { %v1193_v61 = vpop.trf.xlu1  ;;  %2741 = vmatprep.mubr.msk.f32.mxu0 %vm813_vm2, %v1578_v63 }
 0x209   : > { %2694 = vmatprep.mubr.msk.f32.mxu1 %vm1203_vm3, %v1193_v61 }
 0x20b   : > { %v1579_v2 = vpop.trf.xlu0 }
 0x20c   : > { %v1194_v0 = vpop.trf.xlu1  ;;  %2742 = vmatmul.mubr.msk.f32.gmra.mxu0 %vm813_vm2, %v1579_v2 }
 0x20d   : > { %2695 = vmatmul.mubr.msk.f32.gmra.mxu1 %vm1203_vm3, %v1194_v0 }
 0x20f   : > { %v1580_v4 = vpop.trf.xlu0 }
 0x210   : > { %v1195_v11 = vpop.trf.xlu1  ;;  %2744 = vmatprep.mubr.msk.f32.mxu0 %vm813_vm2, %v1580_v4 }
 0x211   : > { %2697 = vmatprep.mubr.msk.f32.mxu1 %vm1203_vm3, %v1195_v11 }
 0x213   : > { %v1581_v6 = vpop.trf.xlu0 }
 0x214   : > { %v1196_v28 = vpop.trf.xlu1  ;;  %2745 = vmatmul.mubr.msk.f32.gmra.mxu0 %vm813_vm2, %v1581_v6 }
 0x215   : > { %2698 = vmatmul.mubr.msk.f32.gmra.mxu1 %vm1203_vm3, %v1196_v28 }
 0x217   : > { %v1582_v9 = vpop.trf.xlu0 }
 0x218   : > { %v1197_v7 = vpop.trf.xlu1  ;;  %2747 = vmatprep.mubr.msk.f32.mxu0 %vm813_vm2, %v1582_v9 }
 0x219   : > { %2700 = vmatprep.mubr.msk.f32.mxu1 %vm1203_vm3, %v1197_v7 }
 0x21b   : > { %v1583_v12 = vpop.trf.xlu0 }
 0x21c   : > { %v1198_v10 = vpop.trf.xlu1  ;;  %2748 = vmatmul.mubr.msk.f32.gmra.mxu0 %vm813_vm2, %v1583_v12 }
 0x21d   : > { %2701 = vmatmul.mubr.msk.f32.gmra.mxu1 %vm1203_vm3, %v1198_v10 }
 0x21f   : > { %v1584_v18 = vpop.trf.xlu0 }
 0x220   : > { %v1199_v14 = vpop.trf.xlu1  ;;  %2750 = vmatprep.mubr.msk.f32.mxu0 %vm813_vm2, %v1584_v18 }
 0x221   : > { %2703 = vmatprep.mubr.msk.f32.mxu1 %vm1203_vm3, %v1199_v14 }
 0x223   : > { %v1585_v19 = vpop.trf.xlu0 }
 0x224   : > { %v1200_v29 = vpop.trf.xlu1  ;;  %2751 = vmatmul.mubr.msk.f32.gmra.mxu0 %vm813_vm2, %v1585_v19 }
 0x225   : > { %2704 = vmatmul.mubr.msk.f32.gmra.mxu1 %vm1203_vm3, %v1200_v29 }
 0x227   : > { %v1586_v20 = vpop.trf.xlu0 }
 0x228   : > { %v1201_v21 = vpop.trf.xlu1  ;;  %2753 = vmatprep.mubr.msk.f32.mxu0 %vm813_vm2, %v1586_v20 }
 0x229   : > { %2706 = vmatprep.mubr.msk.f32.mxu1 %vm1203_vm3, %v1201_v21 }
 0x22b   : > { %v1587_v23 = vpop.trf.xlu0 }
 0x22c   : > { %v1202_v22 = vpop.trf.xlu1  ;;  %2754 = vmatmul.mubr.msk.f32.gmra.mxu0 %vm813_vm2, %v1587_v23 }
 0x22d   : > { %2707 = vmatmul.mubr.msk.f32.gmra.mxu1 %vm1203_vm3, %v1202_v22 }
 0x22f   : > { %v1588_v26 = vpop.trf.xlu0 }
 0x230   : > { %2756 = vmatprep.mubr.msk.f32.mxu0 %vm813_vm2, %v1588_v26 }
 0x233   : > { %v1589_v27 = vpop.trf.xlu0 }
 0x234   : > { %2757 = vmatmul.mubr.msk.f32.gmra.mxu0 %vm813_vm2, %v1589_v27  ;;  %v2822_v27 = vld [vmem:[%s2948_s30 + $0x11] ss:$8 sm:$0x3] }
 0x23c   : > { %v2613_v30 = vpop.f32.mrf.mxu0 }
 0x23e   : > { %v980_v31 = vpop.f32.mrf.mxu0 }
 0x244   : > { %v2616_v48 = vpop.f32.mrf.mxu0 }
 0x246   : > { %v990_v32 = vpop.f32.mrf.mxu0 }
 0x24c   : > { %v2619_v33 = vpop.f32.mrf.mxu0 }
 0x24e   : > { %v1000_v34 = vpop.f32.mrf.mxu0 }
 0x254   : > { %v2622_v25 = vpop.f32.mrf.mxu0 }
 0x255   : > { %v3181_v35 = vpop.f32.mrf.mxu1 }
 0x256   : > { %v1010_v38 = vpop.f32.mrf.mxu0 }
 0x257   : > { %v3183_v37 = vpop.f32.mrf.mxu1 }
 0x25c   : > { %v3187_v41 = vpop.f32.mrf.mxu0 }
 0x25d   : > { %v3185_v40 = vpop.f32.mrf.mxu1 }
 0x25e   : > { %v3191_v47 = vpop.f32.mrf.mxu0 }
 0x25f   : > { %v3189_v43 = vpop.f32.mrf.mxu1 }
 0x264   : > { %v3195_v51 = vpop.f32.mrf.mxu0 }
 0x265   : > { %v3193_v50 = vpop.f32.mrf.mxu1 }
 0x266   : > { %v3199_v52 = vpop.f32.mrf.mxu0 }
 0x267   : > { %v3197_v24 = vpop.f32.mrf.mxu1 }
 0x26c   : > { %v3203_v55 = vpop.f32.mrf.mxu0 }
 0x26d   : > { %v3201_v53 = vpop.f32.mrf.mxu1 }
 0x26e   : > { %v3207_v36 = vpop.f32.mrf.mxu0 }
 0x26f   : > { %v3205_v56 = vpop.f32.mrf.mxu1 }
 0x274   : > { %v3209_v57 = vpop.f32.mrf.mxu0 }
 0x275   : > { %v2663_v39 = vpop.f32.mrf.mxu1 }
 0x276   : > { %v1372_v58 = vadd.f32 %v2663_v39, %v2613_v30  ;;  %v3211_v49 = vpop.f32.mrf.mxu0  ;;  %v3244_v30 = vrot.slane %v2822_v27, %v311_v17 }
 0x277   : > { %v1366_v42 = vpop.f32.mrf.mxu1 }
 0x278   : > { %v1367_v44 = vadd.f32 %v1366_v42, %v980_v31  ;;  %v3213_v46 = vpop.f32.mrf.mxu0  ;;  %3479 = vst [vmem:[#allocation17_spill] sm:$0xff] %v3244_v30 }
 0x279   : > { %3469 = vst [vmem:[#allocation7_spill] sm:$0xff] %v3213_v46 }
 0x27a   : > { %v3215_v54 = vpop.f32.mrf.mxu0 }
 0x27b   : > { %3470 = vst [vmem:[#allocation8_spill] sm:$0xff] %v3215_v54 }
 0x27c   : > { %v3217_v60 = vpop.f32.mrf.mxu0 }
 0x27d   : > { %v2666_v59 = vpop.f32.mrf.mxu1  ;;  %3471 = vst [vmem:[#allocation9_spill] sm:$0xff] %v3217_v60 }
 0x27e   : > { %v1382_v61 = vadd.f32 %v2666_v59, %v2616_v48  ;;  %v3219_v63 = vpop.f32.mrf.mxu0 }
 0x27f   : > { %v1376_v62 = vpop.f32.mrf.mxu1  ;;  %3472 = vst [vmem:[#allocation10_spill] sm:$0xff] %v3219_v63 }
 0x280   : > { %v1377_v0 = vadd.f32 %v1376_v62, %v990_v32  ;;  %v3221_v1 = vpop.f32.mrf.mxu0  ;;  %v3248_v32 = vpop.permute.xlu1 %1994 }
 0x281   : > { %3481 = vst [vmem:[#allocation19_spill] sm:$0xff] %v3248_v32  ;;  %vm2025_vm4 = vcmp.eq.s32.totalorder %v3248_v32, %v2967_v16  ;;  %vm2026_vm5 = vcmp.eq.s32.totalorder %v3248_v32, %v3244_v30 }
 0x282   : > { %v3223_v2 = vpop.f32.mrf.mxu0 }
 0x284   : > { %v3225_v3 = vpop.f32.mrf.mxu0 }
 0x285   : > { %v2669_v11 = vpop.f32.mrf.mxu1 }
 0x286   : > { %v1392_v4 = vadd.f32 %v2669_v11, %v2619_v33  ;;  %v3227_v5 = vpop.f32.mrf.mxu0 }
 0x287   : > { %v1386_v28 = vpop.f32.mrf.mxu1 }
 0x288   : > { %v1387_v6 = vadd.f32 %v1386_v28, %v1000_v34  ;;  %v2713_v7 = vpop.f32.mrf.mxu0 }
 0x289   : > { %v3229_v8 = vadd.f32 %v2713_v7, %v1372_v58 }
 0x28a   : > { %v1755_v9 = vpop.f32.mrf.mxu0 }
 0x28b   : > { %3473 = vst [vmem:[#allocation11_spill] sm:$0xff] %v3229_v8  ;;  %v3231_v10 = vadd.f32 %v1755_v9, %v1367_v44 }
 0x28c   : > { %v2716_v12 = vpop.f32.mrf.mxu0 }
 0x28d   : > { %3474 = vst [vmem:[#allocation12_spill] sm:$0xff] %v3231_v10  ;;  %v2672_v45 = vpop.f32.mrf.mxu1  ;;  %v3233_v15 = vadd.f32 %v2716_v12, %v1382_v61 }
 0x28e   : > { %v1402_v14 = vadd.f32 %v2672_v45, %v2622_v25  ;;  %v1765_v29 = vpop.f32.mrf.mxu0  ;;  %v3461_v25 = vmov 1.0  }
 0x28f   : > { %3475 = vst [vmem:[#allocation13_spill] sm:$0xff] %v3233_v15  ;;  %v1396_v18 = vpop.f32.mrf.mxu1  ;;  %v3235_v21 = vadd.f32 %v1765_v29, %v1377_v0  ;;  %2432 = vmatprep.mubr.msk.f32.mxu1 %vm2026_vm5, %v3461_v25 }
 0x290   : > { %v1397_v19 = vadd.f32 %v1396_v18, %v1010_v38  ;;  %v2719_v20 = vpop.f32.mrf.mxu0 }
 0x291   : > { %3476 = vst [vmem:[#allocation14_spill] sm:$0xff] %v3235_v21  ;;  %v3237_v22 = vadd.f32 %v2719_v20, %v1392_v4 }
 0x292   : > { %v1775_v23 = vpop.f32.mrf.mxu0 }
 0x293   : > { %3477 = vst [vmem:[#allocation15_spill] sm:$0xff] %v3237_v22  ;;  %v3239_v26 = vadd.f32 %v1775_v23, %v1387_v6 }
 0x294   : > { %v2722_v31 = vpop.f32.mrf.mxu0 }
 0x295   : > { %3478 = vst [vmem:[#allocation16_spill] sm:$0xff] %v3239_v26  ;;  %v3246_v48 = vadd.f32 %v2722_v31, %v1402_v14  ;;  %v3257_v13 = vpop.f32.mrf.mxu1 }
 0x296   : > { %v1785_v33 = vpop.f32.mrf.mxu0 }
 0x297   : > { %3480 = vst [vmem:[#allocation18_spill] sm:$0xff] %v3246_v48  ;;  %v3254_v34 = vadd.f32 %v1785_v33, %v1397_v19  ;;  %v3259_v17 = vpop.f32.mrf.mxu1 }
 0x299   : > { %3482 = vst [vmem:[#allocation20_spill] sm:$0xff] %v3254_v34 }
 0x29c   : > { %v3261_v39 = vpop.f32.mrf.mxu0 }
 0x29d   : > { %v2678_v38 = vpop.f32.mrf.mxu1 }
 0x29e   : > { %v3265_v42 = vpop.f32.mrf.mxu0 }
 0x29f   : > { %v3263_v58 = vpop.f32.mrf.mxu1 }
 0x2a4   : > { %v3267_v59 = vpop.f32.mrf.mxu0 }
 0x2a5   : > { %v2681_v44 = vpop.f32.mrf.mxu1 }
 0x2a6   : > { %v3269_v62 = vpop.f32.mrf.mxu0 }
 0x2a7   : > { %v1426_v61 = vpop.f32.mrf.mxu1 }
 0x2ac   : > { %v2731_v11 = vpop.f32.mrf.mxu0 }
 0x2ad   : > { %v2684_v0 = vpop.f32.mrf.mxu1 }
 0x2ae   : > { %v1815_v28 = vpop.f32.mrf.mxu0 }
 0x2af   : > { %v1436_v4 = vpop.f32.mrf.mxu1 }
 0x2b4   : > { %v2734_v7 = vpop.f32.mrf.mxu0 }
 0x2b5   : > { %v3271_v6 = vpop.f32.mrf.mxu1 }
 0x2b6   : > { %3483 = vst [vmem:[#allocation21_spill] sm:$0xff] %v3271_v6  ;;  %v1825_v45 = vpop.f32.mrf.mxu0  ;;  %v1442_v6 = vadd.f32 %v2684_v0, %v3209_v57  ;;  %v3313_v57 = vld [vmem:[%s3459_s5] ss:$0 sm:$0xff] }
 0x2b7   : > { %v3273_v9 = vpop.f32.mrf.mxu1 }
 0x2b8   : > { %3484 = vst [vmem:[#allocation22_spill] sm:$0xff] %v3273_v9 }
 0x2bc   : > { %v3277_v14 = vpop.f32.mrf.mxu0 }
 0x2bd   : > { %v3275_v12 = vpop.f32.mrf.mxu1  ;;  %3486 = vst [vmem:[#allocation24_spill] sm:$0xff] %v3277_v14 }
 0x2be   : > { %3485 = vst [vmem:[#allocation23_spill] sm:$0xff] %v3275_v12  ;;  %v3281_v29 = vpop.f32.mrf.mxu0  ;;  %v1929_v12 = vadd.f32 %v2734_v7, %v1442_v6 }
 0x2bf   : > { %v3279_v18 = vpop.f32.mrf.mxu1  ;;  %3488 = vst [vmem:[#allocation26_spill] sm:$0xff] %v3281_v29 }
 0x2c0   : > { %3487 = vst [vmem:[#allocation25_spill] sm:$0xff] %v3279_v18 }
 0x2c4   : > { %v3285_v20 = vpop.f32.mrf.mxu0 }
 0x2c5   : > { %v3283_v19 = vpop.f32.mrf.mxu1  ;;  %3489 = vst [vmem:[#allocation27_spill] sm:$0xff] %v3285_v20 }
 0x2c6   : > { %v3289_v27 = vpop.f32.mrf.mxu0 }
 0x2c7   : > { %v3287_v23 = vpop.f32.mrf.mxu1  ;;  %3491 = vst [vmem:[#allocation29_spill] sm:$0xff] %v3289_v27 }
 0x2c8   : > { %3490 = vst [vmem:[#allocation28_spill] sm:$0xff] %v3287_v23 }
 0x2cc   : > { %v3293_v33 = vpop.f32.mrf.mxu0 }
 0x2cd   : > { %v3291_v31 = vpop.f32.mrf.mxu1  ;;  %3492 = vst [vmem:[#allocation30_spill] sm:$0xff] %v3293_v33  ;;  %v1432_v33 = vadd.f32 %v2681_v44, %v3203_v55 }
 0x2ce   : > { %v3297_v16 = vpop.f32.mrf.mxu0 }
 0x2cf   : > { %v3295_v25 = vpop.f32.mrf.mxu1  ;;  %3493 = vst [vmem:[#allocation31_spill] sm:$0xff] %v3297_v16  ;;  %v1437_v16 = vadd.f32 %v1436_v4, %v3211_v49  ;;  %v1927_v44 = vadd.f32 %v2731_v11, %v1432_v33  ;;  %v3504_v33 = vld [vmem:[#allocation20_spill] sm:$0xff] }
 0x2d1   : > { %v1928_v49 = vadd.f32 %v1825_v45, %v1437_v16  ;;  %v1417_v16 = vadd.f32 %v3263_v58, %v3199_v52 }
 0x2d4   : > { %v3299_v30 = vpop.f32.mrf.mxu0  ;;  %v3499_v45 = vld [vmem:[#allocation30_spill] sm:$0xff] }
 0x2d5   : > { %v2699_v32 = vpop.f32.mrf.mxu1 }
 0x2d6   : > { %v3301_v8 = vpop.f32.mrf.mxu0 }
 0x2d7   : > { %v1486_v10 = vpop.f32.mrf.mxu1  ;;  %3494 = vst [vmem:[#allocation32_spill] sm:$0xff] %v3301_v8 }
 0x2d8   : > { %v1487_v52 = vadd.f32 %v1486_v10, %v3183_v37 }
 0x2dc   : > { %v2749_v29 = vpop.f32.mrf.mxu0 }
 0x2dd   : > { %v2702_v21 = vpop.f32.mrf.mxu1 }
 0x2de   : > { %v1875_v14 = vpop.f32.mrf.mxu0 }
 0x2df   : > { %v1496_v15 = vpop.f32.mrf.mxu1  ;;  %v1938_v10 = vadd.f32 %v1875_v14, %v1487_v52  ;;  %v2001_v52 = vpop.permute.xlu1 %2000 }
 0x2e4   : > { %v2752_v27 = vpop.f32.mrf.mxu0 }
 0x2e5   : > { %v2705_v26 = vpop.f32.mrf.mxu1 }
 0x2e6   : > { %v1885_v54 = vpop.f32.mrf.mxu0  ;;  %v1512_v63 = vadd.f32 %v2705_v26, %v3193_v50  ;;  %v1502_v50 = vadd.f32 %v2702_v21, %v3185_v40  ;;  %v1967_v40 = vadd.f32 %v3313_v57, %v1928_v49  ;;  %v3505_v49 = vld [vmem:[#allocation7_spill] sm:$0xff] }
 0x2e7   : > { %v1506_v9 = vpop.f32.mrf.mxu1 }
 0x2e8   : > { %v1507_v8 = vadd.f32 %v1506_v9, %v3197_v24  ;;  %v1968_v24 = vadd.f32 %v3313_v57, %v1929_v12  ;;  %v1941_v21 = vadd.f32 %v2752_v27, %v1502_v50  ;;  %v3498_v9 = vld [vmem:[#allocation23_spill] sm:$0xff] }
 0x2ec   : > { %v2755_v20 = vpop.f32.mrf.mxu0 }
 0x2ed   : > { %v2708_v22 = vpop.f32.mrf.mxu1  ;;  %v1943_v26 = vadd.f32 %v2755_v20, %v1512_v63  ;;  %v1492_v63 = vadd.f32 %v2699_v32, %v3181_v35  ;;  %v1407_v35 = vadd.f32 %v3259_v17, %v3191_v47  ;;  %v1924_v32 = vadd.f32 %v3269_v62, %v1417_v16 }
 0x2ee   : > { %v1522_v34 = vadd.f32 %v2708_v22, %v3201_v53  ;;  %v1895_v18 = vpop.f32.mrf.mxu0  ;;  %v1427_v53 = vadd.f32 %v1426_v61, %v3207_v36  ;;  %v1477_v47 = vadd.f32 %v3295_v25, %v3227_v5  ;;  %v1472_v62 = vadd.f32 %v3283_v19, %v3221_v1  ;;  %v3495_v5 = vld [vmem:[#allocation28_spill] sm:$0xff]  ;;  %v3497_v1 = vld [vmem:[#allocation9_spill] sm:$0xff] }
 0x2ef   : > { %v1516_v46 = vpop.f32.mrf.mxu1  ;;  %v1922_v61 = vadd.f32 %v3265_v42, %v1407_v35  ;;  %v1467_v25 = vadd.f32 %v3495_v5, %v3223_v2  ;;  %v1977_v42 = vadd.f32 %v3313_v57, %v1938_v10  ;;  %v3501_v2 = vld [vmem:[#allocation10_spill] sm:$0xff]  ;;  %v3502_v19 = vld [vmem:[#allocation25_spill] sm:$0xff] }
 0x2f0   : > { %v1517_v48 = vadd.f32 %v1516_v46, %v3205_v56  ;;  %v1422_v46 = vadd.f32 %v2678_v38, %v3195_v51  ;;  %v1926_v36 = vadd.f32 %v1815_v28, %v1427_v53  ;;  %v1982_v51 = vadd.f32 %v3313_v57, %v1943_v26  ;;  %v3496_v28 = vld [vmem:[#allocation32_spill] sm:$0xff]  ;;  %v3507_v26 = vld [vmem:[#allocation27_spill] sm:$0xff] }
 0x2f1   : > { %v1936_v6 = vadd.f32 %v3496_v28, %v1477_v47  ;;  %v1961_v7 = vadd.f32 %v3313_v57, %v1922_v61  ;;  %v1935_v12 = vadd.f32 %v3499_v45, %v1472_v62  ;;  %v1457_v20 = vadd.f32 %v3502_v19, %v3501_v2  ;;  %v3518_v47 = vld [vmem:[#allocation12_spill] sm:$0xff]  ;;  %v3519_v61 = vld [vmem:[#allocation17_spill] sm:$0xff]  ;;  %v2073_v28 = vld [vmem:[#allocation3] sm:$0xff] }
 0x2f2   : > { %v1965_v58 = vadd.f32 %v3313_v57, %v1926_v36  ;;  %v1959_v53 = vadd.f32 %v3313_v57, %v3504_v33  ;;  %v1953_v10 = vadd.f32 %v3313_v57, %v3518_v47  ;;  %vm2030_vm8 = vcmp.eq.s32.totalorder %v2001_v52, %v3519_v61 }
 0x2f4   : > { %v2758_v60 = vpop.f32.mrf.mxu0 }
 0x2f5   : > { %v1945_v23 = vadd.f32 %v2758_v60, %v1522_v34  ;;  %v1497_v60 = vadd.f32 %v1496_v15, %v3189_v43  ;;  %v1942_v34 = vadd.f32 %v1895_v18, %v1507_v8  ;;  %v1412_v43 = vadd.f32 %v3257_v13, %v3187_v41  ;;  %v3500_v18 = vld [vmem:[#allocation18_spill] sm:$0xff] }
 0x2f6   : > { %v1905_v22 = vpop.f32.mrf.mxu0  ;;  %v1925_v8 = vadd.f32 %v3267_v59, %v1422_v46  ;;  %v1966_v15 = vadd.f32 %v3313_v57, %v1927_v44  ;;  %v1482_v41 = vadd.f32 %v3291_v31, %v3225_v3  ;;  %v1939_v13 = vadd.f32 %v2749_v29, %v1492_v63  ;;  %v3508_v46 = vld [vmem:[#allocation15_spill] sm:$0xff] }
 0x2f7   : > { %v1984_v56 = vadd.f32 %v3313_v57, %v1945_v23  ;;  %v1944_v55 = vadd.f32 %v1905_v22, %v1517_v48  ;;  %v1940_v48 = vadd.f32 %v1885_v54, %v1497_v60  ;;  %v1981_v38 = vadd.f32 %v3313_v57, %v1942_v34  ;;  %v3503_v23 = vld [vmem:[#allocation31_spill] sm:$0xff]  ;;  %v3506_v22 = vld [vmem:[#allocation21_spill] sm:$0xff]  ;;  %v3510_v60 = vld [vmem:[#allocation22_spill] sm:$0xff] }
 0x2f8   : > { %v1980_v59 = vadd.f32 %v3313_v57, %v1941_v21  ;;  %v1923_v37 = vadd.f32 %v3261_v39, %v1412_v43  ;;  %v1964_v54 = vadd.f32 %v3313_v57, %v1925_v8  ;;  %v1963_v3 = vadd.f32 %v3313_v57, %v1924_v32  ;;  %v3513_v21 = vld [vmem:[#allocation24_spill] sm:$0xff]  ;;  %v3514_v8 = vld [vmem:[#allocation13_spill] sm:$0xff]  ;;  %v3516_v32 = vld [vmem:[#allocation14_spill] sm:$0xff] }
 0x2f9   : > { %v1983_v0 = vadd.f32 %v3313_v57, %v1944_v55  ;;  %2553 = vmatprep.subr.mxu1 %v1984_v56  ;;  %v1979_v17 = vadd.f32 %v3313_v57, %v1940_v48  ;;  %v1937_v39 = vadd.f32 %v3299_v30, %v1482_v41  ;;  %v1978_v11 = vadd.f32 %v3313_v57, %v1939_v13  ;;  %v3515_v48 = vld [vmem:[#allocation26_spill] sm:$0xff]  ;;  %v3517_v13 = vld [vmem:[#allocation11_spill] sm:$0xff] }
 0x2fa   : > { %2554 = vmatpush3.msra.mxu1 %v1968_v24  ;;  %v1962_v4 = vadd.f32 %v3313_v57, %v1923_v37  ;;  %v1462_v30 = vadd.f32 %v3498_v9, %v3497_v1  ;;  %v1960_v29 = vadd.f32 %v3313_v57, %v3500_v18  ;;  %v1934_v27 = vadd.f32 %v3503_v23, %v1467_v25  ;;  %v3509_v24 = vld [vmem:[#allocation8_spill] sm:$0xff]  ;;  %v2074_v9 = vld [vmem:[#allocation3 + $0x8] sm:$0xff]  ;;  %v2076_v23 = vld [vmem:[#allocation3 + $0x18] sm:$0xff] }
 0x2fb   : > { %2555 = vmatprep.subr.mxu1 %v1983_v0  ;;  %v1976_v14 = vadd.f32 %v3313_v57, %v1937_v39  ;;  %v1975_v31 = vadd.f32 %v3313_v57, %v1936_v6  ;;  %v1452_v50 = vadd.f32 %v3506_v22, %v3505_v49  ;;  %v1974_v55 = vadd.f32 %v3313_v57, %v1935_v12  ;;  %v3511_v0 = vld [vmem:[#allocation29_spill] sm:$0xff]  ;;  %v3522_v39 = vld [vmem:[#allocation6_spill] sm:$0xff]  ;;  %v2075_v18 = vld [vmem:[#allocation3 + $0x10] sm:$0xff] }
 0x2fc   : > { %2556 = vmatpush3.msra.mxu1 %v1967_v40  ;;  %v1933_v56 = vadd.f32 %v3507_v26, %v1462_v30  ;;  %v1958_v44 = vadd.f32 %v3313_v57, %v3508_v46  ;;  %v1447_v34 = vadd.f32 %v3510_v60, %v3509_v24  ;;  %v1932_v16 = vadd.f32 %v3511_v0, %v1457_v20  ;;  %v3512_v40 = vld [vmem:[#allocation16_spill] sm:$0xff]  ;;  %v2077_v49 = vld [vmem:[#allocation3 + $0x20] sm:$0xff] }
 0x2fd   : > { %2557 = vmatprep.subr.mxu1 %v1982_v51  ;;  %v1973_v36 = vadd.f32 %v3313_v57, %v1934_v27  ;;  %v1957_v63 = vadd.f32 %v3313_v57, %v3512_v40  ;;  %v1931_v51 = vadd.f32 %v3513_v21, %v1452_v50  ;;  %vm2029_vm9 = vcmp.eq.s32.totalorder %v2001_v52, %v3522_v39 }
 0x2fe   : > { %2558 = vmatpush3.msra.mxu1 %v1966_v15  ;;  %v1972_v43 = vadd.f32 %v3313_v57, %v1933_v56  ;;  %v1956_v15 = vadd.f32 %v3313_v57, %v3514_v8  ;;  %v1971_v35 = vadd.f32 %v3313_v57, %v1932_v16 }
 0x2ff   : > { %2559 = vmatprep.subr.mxu1 %v1981_v38  ;;  %v1930_v38 = vadd.f32 %v3515_v48, %v1447_v34  ;;  %v1970_v41 = vadd.f32 %v3313_v57, %v1931_v51  ;;  %v2079_v34 = vld [vmem:[#allocation3 + $0x30] sm:$0xff] }
 0x300   : > { %2560 = vmatpush3.msra.mxu1 %v1965_v58  ;;  %v1955_v58 = vadd.f32 %v3313_v57, %v3516_v32 }
 0x301   : > { %2561 = vmatprep.subr.mxu1 %v1980_v59  ;;  %v1954_v59 = vadd.f32 %v3313_v57, %v3517_v13  ;;  %v1969_v37 = vadd.f32 %v3313_v57, %v1930_v38 }
 0x302   : > { %2562 = vmatpush3.msra.mxu1 %v1964_v54  ;;  %v1998_v54 = vpop.permute.xlu0 %1997 }
 0x303   : > { %2563 = vmatprep.subr.mxu1 %v1979_v17  ;;  %v2004_v17 = vpop.permute.xlu1 %2003  ;;  %vm2028_vm6 = vcmp.eq.s32.totalorder %v1998_v54, %v3519_v61  ;;  %vm2027_vm7 = vcmp.eq.s32.totalorder %v1998_v54, %v3522_v39 }
 0x304   : > { %2564 = vmatpush3.msra.mxu1 %v1963_v3  ;;  %v3520_v3 = vmov 1.0   ;;  %vm2032_vm10 = vcmp.eq.s32.totalorder %v2004_v17, %v3519_v61  ;;  %vm2031_vm11 = vcmp.eq.s32.totalorder %v2004_v17, %v3522_v39 }
 0x305   : > { %2565 = vmatprep.subr.mxu1 %v1978_v11 }
 0x306   : > { %2566 = vmatpush3.msra.mxu1 %v1962_v4 }
 0x307   : > { %2567 = vmatprep.subr.mxu1 %v1977_v42  ;;  %v2007_v11 = vpop.permute.xlu1 %2006 }
 0x308   : > { %2568 = vmatpush3.msra.mxu1 %v1961_v7  ;;  %vm2034_vm12 = vcmp.eq.s32.totalorder %v2007_v11, %v3519_v61  ;;  %vm2033_vm13 = vcmp.eq.s32.totalorder %v2007_v11, %v3522_v39 }
 0x309   : > { %2569 = vmatprep.subr.mxu1 %v1976_v14 }
 0x30a   : > { %2570 = vmatpush3.msra.mxu1 %v1960_v29 }
 0x30b   : > { %2571 = vmatprep.subr.mxu1 %v1975_v31  ;;  %v2010_v57 = vpop.permute.xlu1 %2009 }
 0x30c   : > { %2572 = vmatpush3.msra.mxu1 %v1959_v53  ;;  %vm2036_vm14 = vcmp.eq.s32.totalorder %v2010_v57, %v3519_v61  ;;  %vm2035_vm15 = vcmp.eq.s32.totalorder %v2010_v57, %v3522_v39 }
 0x30d   : > { %2573 = vmatprep.subr.mxu1 %v1974_v55  ;;  %v2078_v55 = vld [vmem:[#allocation3 + $0x28] sm:$0xff] }
 0x30e   : > { %2574 = vmatpush3.msra.mxu1 %v1958_v44 }
 0x30f   : > { %2575 = vmatprep.subr.mxu1 %v1973_v36  ;;  %v2013_v4 = vpop.permute.xlu1 %2012 }
 0x310   : > { %2576 = vmatpush3.msra.mxu1 %v1957_v63  ;;  %vm2038_vm0 = vcmp.eq.s32.totalorder %v2013_v4, %v3519_v61  ;;  %vm2037_vm1 = vcmp.eq.s32.totalorder %v2013_v4, %v3522_v39  ;;  %v2080_v63 = vld [vmem:[#allocation3 + $0x38] sm:$0xff] }
 0x311   : > { %2577 = vmatprep.subr.mxu1 %v1972_v43 }
 0x312   : > { %2578 = vmatpush3.msra.mxu1 %v1956_v15 }
 0x313   : > { %2579 = vmatprep.subr.mxu1 %v1971_v35  ;;  %v2016_v5 = vpop.permute.xlu1 %2015 }
 0x314   : > { %2580 = vmatpush3.msra.mxu1 %v1955_v58  ;;  %vm2040_vm2 = vcmp.eq.s32.totalorder %v2016_v5, %v3519_v61  ;;  %vm2039_vm3 = vcmp.eq.s32.totalorder %v2016_v5, %v3522_v39 }
 0x315   : > { %2581 = vmatprep.subr.mxu1 %v1970_v41 }
 0x316   : > { %2582 = vmatpush3.msra.mxu1 %v1954_v59 }
 0x317   : > { %2583 = vmatprep.subr.mxu1 %v1969_v37 }
 0x318   : > { %2584 = vmatpush3.msra.mxu1 %v1953_v10 }
 0x319   : > { %2433 = vmatmul.mubr.msk.f32.vlgmr.msra.gmra.mxu1 %vm2025_vm4, %v3520_v3 }
 0x31a   : > { %2434 = vmatprep.mubr.msk.f32.mxu1 %vm2028_vm6, %v3520_v3 }
 0x31d   : > { %2435 = vmatmul.mubr.msk.f32.gmra.mxu1 %vm2027_vm7, %v3520_v3 }
 0x31e   : > { %2436 = vmatprep.mubr.msk.f32.mxu1 %vm2030_vm8, %v3520_v3 }
 0x321   : > { %2437 = vmatmul.mubr.msk.f32.gmra.mxu1 %vm2029_vm9, %v3520_v3 }
 0x322   : > { %2438 = vmatprep.mubr.msk.f32.mxu1 %vm2032_vm10, %v3520_v3 }
 0x325   : > { %2439 = vmatmul.mubr.msk.f32.gmra.mxu1 %vm2031_vm11, %v3520_v3 }
 0x326   : > { %2440 = vmatprep.mubr.msk.f32.mxu1 %vm2034_vm12, %v3520_v3 }
 0x329   : > { %2441 = vmatmul.mubr.msk.f32.gmra.mxu1 %vm2033_vm13, %v3520_v3 }
 0x32a   : > { %2442 = vmatprep.mubr.msk.f32.mxu1 %vm2036_vm14, %v3520_v3 }
 0x32d   : > { %2443 = vmatmul.mubr.msk.f32.gmra.mxu1 %vm2035_vm15, %v3520_v3 }
 0x32e   : > { %2444 = vmatprep.mubr.msk.f32.mxu1 %vm2038_vm0, %v3520_v3 }
 0x331   : > { %2445 = vmatmul.mubr.msk.f32.gmra.mxu1 %vm2037_vm1, %v3520_v3 }
 0x332   : > { %2446 = vmatprep.mubr.msk.f32.mxu1 %vm2040_vm2, %v3520_v3 }
 0x335   : > { %2447 = vmatmul.mubr.msk.f32.gmra.mxu1 %vm2039_vm3, %v3520_v3 }
 0x3d9   : > { %v2585_v25 = vpop.f32.mrf.mxu1 }
 0x3db   : > { %v2586_v6 = vpop.f32.mrf.mxu1 }
 0x3dc   : > { %v2587_v42 = vadd.f32 %v2586_v6, %v2585_v25 }
 0x3dd   : > { %v2588_v7 = vpop.f32.mrf.mxu1 }
 0x3de   : > { %v2186_v1 = vadd.f32 %v2587_v42, %v2073_v28 }
 0x3df   : > { %v2589_v30 = vpop.f32.mrf.mxu1 }
 0x3e0   : > { %2194 = vst [vmem:[#allocation3] sm:$0xff] %v2186_v1  ;;  %v2590_v45 = vadd.f32 %v2589_v30, %v2588_v7 }
 0x3e1   : > { %v2591_v12 = vpop.f32.mrf.mxu1 }
 0x3e2   : > { %v2187_v14 = vadd.f32 %v2590_v45, %v2074_v9 }
 0x3e3   : > { %v2592_v29 = vpop.f32.mrf.mxu1 }
 0x3e4   : > { %2195 = vst [vmem:[#allocation3 + $0x8] sm:$0xff] %v2187_v14  ;;  %v2593_v2 = vadd.f32 %v2592_v29, %v2591_v12 }
 0x3e5   : > { %v2594_v19 = vpop.f32.mrf.mxu1 }
 0x3e6   : > { %v2188_v20 = vadd.f32 %v2593_v2, %v2075_v18 }
 0x3e7   : > { %v2595_v27 = vpop.f32.mrf.mxu1 }
 0x3e8   : > { %2196 = vst [vmem:[#allocation3 + $0x10] sm:$0xff] %v2188_v20  ;;  %v2596_v31 = vadd.f32 %v2595_v27, %v2594_v19 }
 0x3e9   : > { %v2597_v33 = vpop.f32.mrf.mxu1 }
 0x3ea   : > { %v2189_v53 = vadd.f32 %v2596_v31, %v2076_v23 }
 0x3eb   : > { %v2598_v22 = vpop.f32.mrf.mxu1 }
 0x3ec   : > { %2197 = vst [vmem:[#allocation3 + $0x18] sm:$0xff] %v2189_v53  ;;  %v2599_v50 = vadd.f32 %v2598_v22, %v2597_v33 }
 0x3ed   : > { %v2600_v26 = vpop.f32.mrf.mxu1 }
 0x3ee   : > { %v2190_v56 = vadd.f32 %v2599_v50, %v2077_v49 }
 0x3ef   : > { %v2601_v46 = vpop.f32.mrf.mxu1 }
 0x3f0   : > { %2198 = vst [vmem:[#allocation3 + $0x20] sm:$0xff] %v2190_v56  ;;  %v2602_v44 = vadd.f32 %v2601_v46, %v2600_v26 }
 0x3f1   : > { %v2603_v24 = vpop.f32.mrf.mxu1 }
 0x3f2   : > { %v2191_v60 = vadd.f32 %v2602_v44, %v2078_v55 }
 0x3f3   : > { %v2604_v0 = vpop.f32.mrf.mxu1 }
 0x3f4   : > { %2199 = vst [vmem:[#allocation3 + $0x28] sm:$0xff] %v2191_v60  ;;  %v2605_v16 = vadd.f32 %v2604_v0, %v2603_v24 }
 0x3f5   : > { %v2606_v36 = vpop.f32.mrf.mxu1 }
 0x3f6   : > { %v2192_v40 = vadd.f32 %v2605_v16, %v2079_v34 }
 0x3f7   : > { %v2607_v21 = vpop.f32.mrf.mxu1 }
 0x3f8   : > { %2200 = vst [vmem:[#allocation3 + $0x30] sm:$0xff] %v2192_v40  ;;  %v2608_v51 = vadd.f32 %v2607_v21, %v2606_v36  ;;  %2205 = sbr.rel (%p2448_p6) target bundleno = 1031 (0x407), region = 52 }
 0x3fa   : > { %v2193_v43 = vadd.f32 %v2608_v51, %v2080_v63 }
 0x3fc   : > { %2201 = vst [vmem:[#allocation3 + $0x38] sm:$0xff] %v2193_v43 }
 0x3fd   : > { %v2206_v8 = vld [vmem:[#allocation3] sm:$0xff]  ;;  %v2207_v15 = vld [vmem:[#allocation3 + $0x8] sm:$0xff]  ;;  %v2208_v52 = vld [vmem:[#allocation3 + $0x10] sm:$0xff] }
 0x3fe   : > { %v2214_v48 = vmax.f32 %v2206_v8, 0.0  ;;  %v2215_v38 = vmax.f32 %v2207_v15, 0.0  ;;  %v2216_v35 = vmax.f32 %v2208_v52, 0.0  ;;  %v2209_v32 = vld [vmem:[#allocation3 + $0x18] sm:$0xff]  ;;  %v2210_v58 = vld [vmem:[#allocation3 + $0x20] sm:$0xff]  ;;  %v2211_v41 = vld [vmem:[#allocation3 + $0x28] sm:$0xff] }
 0x3ff   : > { %v2217_v13 = vmax.f32 %v2209_v32, 0.0  ;;  %v2218_v59 = vmax.f32 %v2210_v58, 0.0  ;;  %v2219_v37 = vmax.f32 %v2211_v41, 0.0  ;;  %v2212_v54 = vld [vmem:[#allocation3 + $0x30] sm:$0xff] }
 0x400   : > { %2222 = vst [vmem:[#allocation3] sm:$0xff] %v2214_v48  ;;  %2223 = vst [vmem:[#allocation3 + $0x8] sm:$0xff] %v2215_v38  ;;  %v2220_v10 = vmax.f32 %v2212_v54, 0.0 }
 0x401   : > { %2224 = vst [vmem:[#allocation3 + $0x10] sm:$0xff] %v2216_v35  ;;  %2225 = vst [vmem:[#allocation3 + $0x18] sm:$0xff] %v2217_v13 }
 0x402   : > { %2226 = vst [vmem:[#allocation3 + $0x20] sm:$0xff] %v2218_v59  ;;  %2227 = vst [vmem:[#allocation3 + $0x28] sm:$0xff] %v2219_v37 }
 0x403   : > { %v2213_v47 = vld [vmem:[#allocation3 + $0x38] sm:$0xff]  ;;  %2228 = vst [vmem:[#allocation3 + $0x30] sm:$0xff] %v2220_v10 }
 0x404   : > { %v2221_v17 = vmax.f32 %v2213_v47, 0.0 }
 0x406   : > { %2229 = vst [vmem:[#allocation3 + $0x38] sm:$0xff] %v2221_v17 }
 0x407 PF: > { %p3430_p7 = scmp.eq.s32.totalorder %s2292_s24, 1  ;;  %s2884_s18 = smov [#allocation3]  }
 0x408   : > { %s2239_s19 = sshll.u32 %s2884_s18, 4  ;;  %s2240_s19 = int_to_ptr.vmem [resolvable:$true] %s2239_s19 }
 0x409   : > { %s2823_s20 = scalar_lea.vmem %s2240_s19, 1024  ;;  %p2830_p11 = scmp.lt.s32.totalorder %s2240_s19, %s2240_s19 }
 0x40a   : > { %p2824_p8 = scmp.ne.s32.totalorder %s2240_s19, %s2823_s20  ;;  %p2831_p12 = scmp.lt.s32.totalorder %s2823_s20, %s2823_s20 }
 0x40c   : > { %p2825_p9 = pnand %p2824_p8, %p3430_p7  ;;  %p2832_p13 = por %p2831_p12, %p2830_p11 }
 0x40e   : > { %p2826_p10 = pneg %p2825_p9 }
 0x410   : > { %p2833_p0 = pnand %p2832_p13, %p2826_p10 }
 0x412   : > { %2836 = shalt.err (!%p2833_p0)
}
 0x413   : > { %s2885_s21 = smov 128   ;;  %s2886_s24 = smov 8  }
 0x414   : > { %2770 = dma.vmem_to_hbm [thread:$0]  (%p3430_p7), %s2240_s19, 1024, %s3460_s6, [#allocation4], %s2885_s21, %s2885_s21, %s2886_s24  }
 0x415   : > { %2860 = dma.done.wait (%p3430_p7), [#allocation4], 1024  }
 0x416   : > { %2862 = vsyncadd (%p3430_p7), [#allocation4], 4294966272 }
 0x417 PF: > { %s17_s23 = sadd.s32 1, %s2873_s23   ;;  %s3524_s21 = smov %s2869_s22 }
 0x418   : > { %p14_p1 = scmp.ge.s32.totalorder %s17_s23, 4   ;;  %s3525_s22 = smov %s3527_s25 }
 0x41a   :  { %16 = sbr.rel (!%p14_p1) target bundleno = 2 (0x2), region = 82 }
 0x41f   :  { %2255 = vsyncpa [#allocation4], 1 }
 0x420   :  { %2257 = vsyncpa [#allocation4 + $0x1], 1 }

</bundles_post_ra>
